<compile_context>
chip_gen: v7x
topology: tpu7x:2x2x1
jax: 0.10.0
libtpu: 0.0.40
codegen_flags: <defaults>
</compile_context>

<pallas_src>
import jax
import jax.numpy as jnp
import numpy as np
from jax.experimental import pallas as pl
from jax.experimental.pallas import tpu as pltpu


def transition_lstm_kernel(
    xin_ref,                       # (T*Bp, D) f32   time-major input, batch padded
    wih0_ref, b0_ref,              # (D, 4H) f32, (1, 4H) f32    layer-0 input proj
    wtop_ref,                      # (H, 8H) bf16  = [whh0 | wih1] wavefront block
    whh1_ref,                      # (H, 4H) bf16                  layer-1 hidden
    b1_ref,                        # (1, 4H) f32
    wout_ref, bout_ref,            # (H, O) f32, (1, O) f32        output head
    out_ref,                       # (Bp, O) f32
):
    Bp, O = out_ref.shape
    TB, D = xin_ref.shape
    T = TB // Bp
    H = wtop_ref.shape[0]

    # (perf #4) layer-0 input projection for ALL timesteps as one parallel matmul,
    # held in vregs (no VMEM scratch round-trip).  f32: off the critical path.
    gxb = (jnp.dot(xin_ref[...], wih0_ref[...],
                   preferred_element_type=jnp.float32) + b0_ref[...])   # (T*Bp, 4H)

    # Hoist small weights/biases into values (fine at H=32; for H >= 128 read them
    # from the refs inside the loop).  Broadcasts hoisted (JAX does not CSE them).
    wtop = wtop_ref[...]                                    # bf16 (H, 8H)
    whh1 = whh1_ref[...]                                    # bf16 (H, 4H)
    b1b = jnp.broadcast_to(b1_ref[...], (Bp, 4 * H))        # f32  (Bp, 4H)

    def cell(gates, c):
        # Full-width EUP sigmoid/tanh on the whole (Bp, 4H) gate tile, then static
        # lane slices in PyTorch gate order [i, f, g, o].  All math in f32.
        sig = jax.nn.sigmoid(gates)
        tnh = jnp.tanh(gates)
        i = sig[:, 0 * H:1 * H]
        f = sig[:, 1 * H:2 * H]
        g = tnh[:, 2 * H:3 * H]
        o = sig[:, 3 * H:4 * H]
        c = f * c + i * g
        h = o * jnp.tanh(c)
        return h, c

    zeros = jnp.zeros((Bp, H), jnp.float32)

    # ---- prologue: layer-0 step t=0 needs no matmul (h0(-1) == 0).
    h0, c0 = cell(gxb[0:Bp, :], zeros)
    h1, c1 = zeros, zeros

    # ---- wavefront stages (perf #1/#2/#3/#5): stage s -> layer-1 at t=s and
    # layer-0 at t=s+1.  One dependent bf16 MXU push (h0 @ [whh0|wih1], N=8H) per
    # stage; the h1 @ whh1 push is independent and overlaps.
    # TODO(synk): for large T use lax.fori_loop with partial unroll and a T-chunked
    # grid (gx in VMEM scratch) instead of full unrolling.
    for s in range(T - 1):
        gm = jnp.dot(h0.astype(jnp.bfloat16), wtop,
                     preferred_element_type=jnp.float32)             # (Bp, 8H)
        g1hh = jnp.dot(h1.astype(jnp.bfloat16), whh1,
                       preferred_element_type=jnp.float32)           # (Bp, 4H)
        # layer 1, timestep s:  h0(s)@wih1 + h1(s-1)@whh1 + b1
        h1, c1 = cell(gm[:, 4 * H:] + g1hh + b1b, c1)
        # layer 0, timestep s+1:  gx[s+1] + h0(s)@whh0   (static, sublane-aligned slice)
        h0, c0 = cell(gm[:, :4 * H] + gxb[(s + 1) * Bp:(s + 2) * Bp, :], c0)

    # ---- epilogue: layer-1 step t = T-1.
    gmE = jnp.dot(h0.astype(jnp.bfloat16), wtop,
                  preferred_element_type=jnp.float32)[:, 4 * H:]
    g1hhE = jnp.dot(h1.astype(jnp.bfloat16), whh1,
                    preferred_element_type=jnp.float32)
    h1, c1 = cell(gmE + g1hhE + b1b, c1)

    # Output head on h_n[-1] (== output[:, -1, :] for a batch_first LSTM).  f32.
    out_ref[...] = (jnp.dot(h1, wout_ref[...],
                            preferred_element_type=jnp.float32) + bout_ref[...])


def transition_lstm(x, params):
    """TransitionLSTM.forward.  x: (B, T, latent_size + state_size) -> (B, latent_size)."""
    B, T, D = x.shape
    wih0, whh0, b0, wih1, whh1, b1, wout, bout = params
    H = whh0.shape[0]
    O = wout.shape[1]

    # (perf #1/#2) wavefront block RHS [whh0 | wih1] shared by the layer-0 hh and
    # layer-1 ih matmuls; bf16 MXU operands, f32 accumulation inside the kernel.
    wtop = jnp.concatenate([whh0, wih1], axis=1).astype(jnp.bfloat16)   # (H, 8H)
    whh1_bf = whh1.astype(jnp.bfloat16)                                 # (H, 4H)

    # (perf #6) pad batch to a multiple of 8 sublanes; flatten time-major so the
    # per-timestep gate rows are 8-aligned static slices of the precomputed gx.
    Bp = max(8, ((B + 7) // 8) * 8)
    xin = jnp.transpose(x.astype(jnp.float32), (1, 0, 2))               # (T, B, D)
    xin = jnp.pad(xin, ((0, 0), (0, Bp - B), (0, 0)))                   # (T, Bp, D)
    xin = xin.reshape(T * Bp, D)                                        # (T*Bp, D)

    vmem = pl.BlockSpec(memory_space=pltpu.MemorySpace.VMEM)
    # (perf #7) grid-less: everything comfortably fits VMEM at these shapes on
    # v5e/v6e/v7x.  See header comment for the long-T / big-B grid variants.
    out = pl.pallas_call(
        transition_lstm_kernel,
        out_shape=jax.ShapeDtypeStruct((Bp, O), jnp.float32),
        in_specs=[vmem] * 8,
        out_specs=vmem,
    )(xin, wih0, b0, wtop, whh1_bf, b1, wout, bout)
    return out[:B]


def init_params(key, input_size, hidden_size, output_size):
    """Deterministic PyTorch-style uniform(-1/sqrt(H), 1/sqrt(H)) init.

    Weights are stored already transposed: (in_features, 4H) / (H, O).
    The two PyTorch bias vectors (bias_ih + bias_hh) are pre-summed per layer.
    """
    H = hidden_size
    k = 1.0 / np.sqrt(H)
    keys = jax.random.split(key, 10)

    def u(kk, shape, bound):
        return jax.random.uniform(kk, shape, jnp.float32, -bound, bound)

    wih0 = u(keys[0], (input_size, 4 * H), k)
    whh0 = u(keys[1], (H, 4 * H), k)
    b0 = u(keys[2], (1, 4 * H), k) + u(keys[3], (1, 4 * H), k)
    wih1 = u(keys[4], (H, 4 * H), k)
    whh1 = u(keys[5], (H, 4 * H), k)
    b1 = u(keys[6], (1, 4 * H), k) + u(keys[7], (1, 4 * H), k)
    wout = u(keys[8], (H, output_size), k)
    bout = u(keys[9], (1, output_size), k)
    return (wih0, whh0, b0, wih1, whh1, b1, wout, bout)


def reference(x, params):
    """Pure-JAX f32 reference matching nn.LSTM(num_layers=2, batch_first=True) + Linear."""
    wih0, whh0, b0, wih1, whh1, b1, wout, bout = params
    B, T, _ = x.shape
    H = whh0.shape[0]

    def cell(x_t, h, c, wih, whh, b):
        gates = x_t @ wih + h @ whh + b
        i = jax.nn.sigmoid(gates[:, :H])
        f = jax.nn.sigmoid(gates[:, H:2 * H])
        g = jnp.tanh(gates[:, 2 * H:3 * H])
        o = jax.nn.sigmoid(gates[:, 3 * H:])
        c = f * c + i * g
        h = o * jnp.tanh(c)
        return h, c

    h0 = c0 = h1 = c1 = jnp.zeros((B, H), jnp.float32)
    for t in range(T):
        h0, c0 = cell(x[:, t, :], h0, c0, wih0, whh0, b0)
        h1, c1 = cell(h0, h1, c1, wih1, whh1, b1)
    return h1 @ wout + bout


if __name__ == "__main__":
    # Small shapes consistent with the module: input_size = latent + state.
    B, T = 2, 8
    latent_size, state_size = 12, 2
    input_size = latent_size + state_size        # 14
    hidden_size = 32
    output_size = latent_size                    # head: Linear(hidden, latent)

    root = jax.random.PRNGKey(0)
    k_x, k_p = jax.random.split(root, 2)
    x = jax.random.normal(k_x, (B, T, input_size), jnp.float32)
    params = init_params(k_p, input_size, hidden_size, output_size)

    out = transition_lstm(x, params)
    out = jax.block_until_ready(out)

    ref = reference(x, params)
    # Tolerance loosened vs the pure-f32 version: the recurrent matmuls now use
    # bf16 MXU operands (f32 accumulation and f32 cell math), per the perf review.
    np.testing.assert_allclose(np.asarray(out), np.asarray(ref), rtol=5e-2, atol=5e-2)
    assert out.shape == (B, output_size)

    print("KERNEL_OK")
</pallas_src>

<mosaic_0001>
module attributes {stable_mosaic.version = 11 : i64} {
  func.func @transition_lstm_kernel(%arg0: memref<64x14xf32, #tpu.memory_space<vmem>>, %arg1: memref<14x128xf32, #tpu.memory_space<vmem>>, %arg2: memref<1x128xf32, #tpu.memory_space<vmem>>, %arg3: memref<32x256xbf16, #tpu.memory_space<vmem>>, %arg4: memref<32x128xbf16, #tpu.memory_space<vmem>>, %arg5: memref<1x128xf32, #tpu.memory_space<vmem>>, %arg6: memref<32x12xf32, #tpu.memory_space<vmem>>, %arg7: memref<1x12xf32, #tpu.memory_space<vmem>>, %arg8: memref<8x12xf32, #tpu.memory_space<vmem>>) attributes {dimension_semantics = [], scalar_prefetch = 0 : i64, scratch_operands = 0 : i64, tpu.core_type = #tpu.core_type<tc>} {
    %c0 = arith.constant 0 : index
    %c0_0 = arith.constant 0 : index
    %0 = vector.load %arg0[%c0, %c0_0] : memref<64x14xf32, #tpu.memory_space<vmem>>, vector<64x14xf32>
    %c0_1 = arith.constant 0 : index
    %c0_2 = arith.constant 0 : index
    %1 = vector.load %arg1[%c0_1, %c0_2] : memref<14x128xf32, #tpu.memory_space<vmem>>, vector<14x128xf32>
    %cst = arith.constant dense<0.000000e+00> : vector<64x128xf32>
    %2 = tpu.matmul %0, %1, %cst {dimension_numbers = #tpu.dot_dimension_numbers<[1], [0], [0], [1], [0, 0, 1, 1], [], []>} : vector<64x14xf32>, vector<14x128xf32>, vector<64x128xf32> -> vector<64x128xf32>
    %c0_3 = arith.constant 0 : index
    %c0_4 = arith.constant 0 : index
    %3 = vector.load %arg2[%c0_3, %c0_4] : memref<1x128xf32, #tpu.memory_space<vmem>>, vector<1x128xf32>
    %4 = vector.broadcast %3 : vector<1x128xf32> to vector<64x128xf32>
    %5 = arith.addf %2, %4 : vector<64x128xf32>
    %c0_5 = arith.constant 0 : index
    %c0_6 = arith.constant 0 : index
    %6 = vector.load %arg3[%c0_5, %c0_6] : memref<32x256xbf16, #tpu.memory_space<vmem>>, vector<32x256xbf16>
    %c0_7 = arith.constant 0 : index
    %c0_8 = arith.constant 0 : index
    %7 = vector.load %arg4[%c0_7, %c0_8] : memref<32x128xbf16, #tpu.memory_space<vmem>>, vector<32x128xbf16>
    %c0_9 = arith.constant 0 : index
    %c0_10 = arith.constant 0 : index
    %8 = vector.load %arg5[%c0_9, %c0_10] : memref<1x128xf32, #tpu.memory_space<vmem>>, vector<1x128xf32>
    %9 = vector.shape_cast %8 : vector<1x128xf32> to vector<1x128xf32>
    %10 = vector.broadcast %9 : vector<1x128xf32> to vector<8x128xf32>
    %cst_11 = arith.constant 0.000000e+00 : f32
    %11 = vector.broadcast %cst_11 : f32 to vector<8x32xf32>
    %12 = vector.extract_strided_slice %5 {offsets = [0, 0], sizes = [8, 128], strides = [1, 1]} : vector<64x128xf32> to vector<8x128xf32>
    %13 = arith.negf %12 : vector<8x128xf32>
    %14 = math.exp %13 : vector<8x128xf32>
    %cst_12 = arith.constant 1.000000e+00 : f32
    %15 = vector.broadcast %cst_12 : f32 to vector<8x128xf32>
    %16 = arith.addf %15, %14 : vector<8x128xf32>
    %17 = arith.divf %15, %16 : vector<8x128xf32>
    %18 = math.tanh %12 : vector<8x128xf32>
    %19 = vector.extract_strided_slice %17 {offsets = [0, 0], sizes = [8, 32], strides = [1, 1]} : vector<8x128xf32> to vector<8x32xf32>
    %20 = vector.extract_strided_slice %17 {offsets = [0, 32], sizes = [8, 32], strides = [1, 1]} : vector<8x128xf32> to vector<8x32xf32>
    %21 = vector.extract_strided_slice %18 {offsets = [0, 64], sizes = [8, 32], strides = [1, 1]} : vector<8x128xf32> to vector<8x32xf32>
    %22 = vector.extract_strided_slice %17 {offsets = [0, 96], sizes = [8, 32], strides = [1, 1]} : vector<8x128xf32> to vector<8x32xf32>
    %23 = arith.mulf %20, %11 : vector<8x32xf32>
    %24 = arith.mulf %19, %21 : vector<8x32xf32>
    %25 = arith.addf %23, %24 : vector<8x32xf32>
    %26 = math.tanh %25 : vector<8x32xf32>
    %27 = arith.mulf %22, %26 : vector<8x32xf32>
    %28 = arith.truncf %27 : vector<8x32xf32> to vector<8x32xbf16>
    %cst_13 = arith.constant dense<0.000000e+00> : vector<8x256xf32>
    %29 = tpu.matmul %28, %6, %cst_13 {dimension_numbers = #tpu.dot_dimension_numbers<[1], [0], [0], [1], [0, 0, 1, 1], [], []>} : vector<8x32xbf16>, vector<32x256xbf16>, vector<8x256xf32> -> vector<8x256xf32>
    %30 = arith.truncf %11 : vector<8x32xf32> to vector<8x32xbf16>
    %cst_14 = arith.constant dense<0.000000e+00> : vector<8x128xf32>
    %31 = tpu.matmul %30, %7, %cst_14 {dimension_numbers = #tpu.dot_dimension_numbers<[1], [0], [0], [1], [0, 0, 1, 1], [], []>} : vector<8x32xbf16>, vector<32x128xbf16>, vector<8x128xf32> -> vector<8x128xf32>
    %32 = vector.extract_strided_slice %29 {offsets = [0, 128], sizes = [8, 128], strides = [1, 1]} : vector<8x256xf32> to vector<8x128xf32>
    %33 = arith.addf %32, %31 : vector<8x128xf32>
    %34 = arith.addf %33, %10 : vector<8x128xf32>
    %35 = arith.negf %34 : vector<8x128xf32>
    %36 = math.exp %35 : vector<8x128xf32>
    %cst_15 = arith.constant 1.000000e+00 : f32
    %37 = vector.broadcast %cst_15 : f32 to vector<8x128xf32>
    %38 = arith.addf %37, %36 : vector<8x128xf32>
    %39 = arith.divf %37, %38 : vector<8x128xf32>
    %40 = math.tanh %34 : vector<8x128xf32>
    %41 = vector.extract_strided_slice %39 {offsets = [0, 0], sizes = [8, 32], strides = [1, 1]} : vector<8x128xf32> to vector<8x32xf32>
    %42 = vector.extract_strided_slice %39 {offsets = [0, 32], sizes = [8, 32], strides = [1, 1]} : vector<8x128xf32> to vector<8x32xf32>
    %43 = vector.extract_strided_slice %40 {offsets = [0, 64], sizes = [8, 32], strides = [1, 1]} : vector<8x128xf32> to vector<8x32xf32>
    %44 = vector.extract_strided_slice %39 {offsets = [0, 96], sizes = [8, 32], strides = [1, 1]} : vector<8x128xf32> to vector<8x32xf32>
    %45 = arith.mulf %42, %11 : vector<8x32xf32>
    %46 = arith.mulf %41, %43 : vector<8x32xf32>
    %47 = arith.addf %45, %46 : vector<8x32xf32>
    %48 = math.tanh %47 : vector<8x32xf32>
    %49 = arith.mulf %44, %48 : vector<8x32xf32>
    %50 = vector.extract_strided_slice %29 {offsets = [0, 0], sizes = [8, 128], strides = [1, 1]} : vector<8x256xf32> to vector<8x128xf32>
    %51 = vector.extract_strided_slice %5 {offsets = [8, 0], sizes = [8, 128], strides = [1, 1]} : vector<64x128xf32> to vector<8x128xf32>
    %52 = arith.addf %50, %51 : vector<8x128xf32>
    %53 = arith.negf %52 : vector<8x128xf32>
    %54 = math.exp %53 : vector<8x128xf32>
    %cst_16 = arith.constant 1.000000e+00 : f32
    %55 = vector.broadcast %cst_16 : f32 to vector<8x128xf32>
    %56 = arith.addf %55, %54 : vector<8x128xf32>
    %57 = arith.divf %55, %56 : vector<8x128xf32>
    %58 = math.tanh %52 : vector<8x128xf32>
    %59 = vector.extract_strided_slice %57 {offsets = [0, 0], sizes = [8, 32], strides = [1, 1]} : vector<8x128xf32> to vector<8x32xf32>
    %60 = vector.extract_strided_slice %57 {offsets = [0, 32], sizes = [8, 32], strides = [1, 1]} : vector<8x128xf32> to vector<8x32xf32>
    %61 = vector.extract_strided_slice %58 {offsets = [0, 64], sizes = [8, 32], strides = [1, 1]} : vector<8x128xf32> to vector<8x32xf32>
    %62 = vector.extract_strided_slice %57 {offsets = [0, 96], sizes = [8, 32], strides = [1, 1]} : vector<8x128xf32> to vector<8x32xf32>
    %63 = arith.mulf %60, %25 : vector<8x32xf32>
    %64 = arith.mulf %59, %61 : vector<8x32xf32>
    %65 = arith.addf %63, %64 : vector<8x32xf32>
    %66 = math.tanh %65 : vector<8x32xf32>
    %67 = arith.mulf %62, %66 : vector<8x32xf32>
    %68 = arith.truncf %67 : vector<8x32xf32> to vector<8x32xbf16>
    %cst_17 = arith.constant dense<0.000000e+00> : vector<8x256xf32>
    %69 = tpu.matmul %68, %6, %cst_17 {dimension_numbers = #tpu.dot_dimension_numbers<[1], [0], [0], [1], [0, 0, 1, 1], [], []>} : vector<8x32xbf16>, vector<32x256xbf16>, vector<8x256xf32> -> vector<8x256xf32>
    %70 = arith.truncf %49 : vector<8x32xf32> to vector<8x32xbf16>
    %cst_18 = arith.constant dense<0.000000e+00> : vector<8x128xf32>
    %71 = tpu.matmul %70, %7, %cst_18 {dimension_numbers = #tpu.dot_dimension_numbers<[1], [0], [0], [1], [0, 0, 1, 1], [], []>} : vector<8x32xbf16>, vector<32x128xbf16>, vector<8x128xf32> -> vector<8x128xf32>
    %72 = vector.extract_strided_slice %69 {offsets = [0, 128], sizes = [8, 128], strides = [1, 1]} : vector<8x256xf32> to vector<8x128xf32>
    %73 = arith.addf %72, %71 : vector<8x128xf32>
    %74 = arith.addf %73, %10 : vector<8x128xf32>
    %75 = arith.negf %74 : vector<8x128xf32>
    %76 = math.exp %75 : vector<8x128xf32>
    %cst_19 = arith.constant 1.000000e+00 : f32
    %77 = vector.broadcast %cst_19 : f32 to vector<8x128xf32>
    %78 = arith.addf %77, %76 : vector<8x128xf32>
    %79 = arith.divf %77, %78 : vector<8x128xf32>
    %80 = math.tanh %74 : vector<8x128xf32>
    %81 = vector.extract_strided_slice %79 {offsets = [0, 0], sizes = [8, 32], strides = [1, 1]} : vector<8x128xf32> to vector<8x32xf32>
    %82 = vector.extract_strided_slice %79 {offsets = [0, 32], sizes = [8, 32], strides = [1, 1]} : vector<8x128xf32> to vector<8x32xf32>
    %83 = vector.extract_strided_slice %80 {offsets = [0, 64], sizes = [8, 32], strides = [1, 1]} : vector<8x128xf32> to vector<8x32xf32>
    %84 = vector.extract_strided_slice %79 {offsets = [0, 96], sizes = [8, 32], strides = [1, 1]} : vector<8x128xf32> to vector<8x32xf32>
    %85 = arith.mulf %82, %47 : vector<8x32xf32>
    %86 = arith.mulf %81, %83 : vector<8x32xf32>
    %87 = arith.addf %85, %86 : vector<8x32xf32>
    %88 = math.tanh %87 : vector<8x32xf32>
    %89 = arith.mulf %84, %88 : vector<8x32xf32>
    %90 = vector.extract_strided_slice %69 {offsets = [0, 0], sizes = [8, 128], strides = [1, 1]} : vector<8x256xf32> to vector<8x128xf32>
    %91 = vector.extract_strided_slice %5 {offsets = [16, 0], sizes = [8, 128], strides = [1, 1]} : vector<64x128xf32> to vector<8x128xf32>
    %92 = arith.addf %90, %91 : vector<8x128xf32>
    %93 = arith.negf %92 : vector<8x128xf32>
    %94 = math.exp %93 : vector<8x128xf32>
    %cst_20 = arith.constant 1.000000e+00 : f32
    %95 = vector.broadcast %cst_20 : f32 to vector<8x128xf32>
    %96 = arith.addf %95, %94 : vector<8x128xf32>
    %97 = arith.divf %95, %96 : vector<8x128xf32>
    %98 = math.tanh %92 : vector<8x128xf32>
    %99 = vector.extract_strided_slice %97 {offsets = [0, 0], sizes = [8, 32], strides = [1, 1]} : vector<8x128xf32> to vector<8x32xf32>
    %100 = vector.extract_strided_slice %97 {offsets = [0, 32], sizes = [8, 32], strides = [1, 1]} : vector<8x128xf32> to vector<8x32xf32>
    %101 = vector.extract_strided_slice %98 {offsets = [0, 64], sizes = [8, 32], strides = [1, 1]} : vector<8x128xf32> to vector<8x32xf32>
    %102 = vector.extract_strided_slice %97 {offsets = [0, 96], sizes = [8, 32], strides = [1, 1]} : vector<8x128xf32> to vector<8x32xf32>
    %103 = arith.mulf %100, %65 : vector<8x32xf32>
    %104 = arith.mulf %99, %101 : vector<8x32xf32>
    %105 = arith.addf %103, %104 : vector<8x32xf32>
    %106 = math.tanh %105 : vector<8x32xf32>
    %107 = arith.mulf %102, %106 : vector<8x32xf32>
    %108 = arith.truncf %107 : vector<8x32xf32> to vector<8x32xbf16>
    %cst_21 = arith.constant dense<0.000000e+00> : vector<8x256xf32>
    %109 = tpu.matmul %108, %6, %cst_21 {dimension_numbers = #tpu.dot_dimension_numbers<[1], [0], [0], [1], [0, 0, 1, 1], [], []>} : vector<8x32xbf16>, vector<32x256xbf16>, vector<8x256xf32> -> vector<8x256xf32>
    %110 = arith.truncf %89 : vector<8x32xf32> to vector<8x32xbf16>
    %cst_22 = arith.constant dense<0.000000e+00> : vector<8x128xf32>
    %111 = tpu.matmul %110, %7, %cst_22 {dimension_numbers = #tpu.dot_dimension_numbers<[1], [0], [0], [1], [0, 0, 1, 1], [], []>} : vector<8x32xbf16>, vector<32x128xbf16>, vector<8x128xf32> -> vector<8x128xf32>
    %112 = vector.extract_strided_slice %109 {offsets = [0, 128], sizes = [8, 128], strides = [1, 1]} : vector<8x256xf32> to vector<8x128xf32>
    %113 = arith.addf %112, %111 : vector<8x128xf32>
    %114 = arith.addf %113, %10 : vector<8x128xf32>
    %115 = arith.negf %114 : vector<8x128xf32>
    %116 = math.exp %115 : vector<8x128xf32>
    %cst_23 = arith.constant 1.000000e+00 : f32
    %117 = vector.broadcast %cst_23 : f32 to vector<8x128xf32>
    %118 = arith.addf %117, %116 : vector<8x128xf32>
    %119 = arith.divf %117, %118 : vector<8x128xf32>
    %120 = math.tanh %114 : vector<8x128xf32>
    %121 = vector.extract_strided_slice %119 {offsets = [0, 0], sizes = [8, 32], strides = [1, 1]} : vector<8x128xf32> to vector<8x32xf32>
    %122 = vector.extract_strided_slice %119 {offsets = [0, 32], sizes = [8, 32], strides = [1, 1]} : vector<8x128xf32> to vector<8x32xf32>
    %123 = vector.extract_strided_slice %120 {offsets = [0, 64], sizes = [8, 32], strides = [1, 1]} : vector<8x128xf32> to vector<8x32xf32>
    %124 = vector.extract_strided_slice %119 {offsets = [0, 96], sizes = [8, 32], strides = [1, 1]} : vector<8x128xf32> to vector<8x32xf32>
    %125 = arith.mulf %122, %87 : vector<8x32xf32>
    %126 = arith.mulf %121, %123 : vector<8x32xf32>
    %127 = arith.addf %125, %126 : vector<8x32xf32>
    %128 = math.tanh %127 : vector<8x32xf32>
    %129 = arith.mulf %124, %128 : vector<8x32xf32>
    %130 = vector.extract_strided_slice %109 {offsets = [0, 0], sizes = [8, 128], strides = [1, 1]} : vector<8x256xf32> to vector<8x128xf32>
    %131 = vector.extract_strided_slice %5 {offsets = [24, 0], sizes = [8, 128], strides = [1, 1]} : vector<64x128xf32> to vector<8x128xf32>
    %132 = arith.addf %130, %131 : vector<8x128xf32>
    %133 = arith.negf %132 : vector<8x128xf32>
    %134 = math.exp %133 : vector<8x128xf32>
    %cst_24 = arith.constant 1.000000e+00 : f32
    %135 = vector.broadcast %cst_24 : f32 to vector<8x128xf32>
    %136 = arith.addf %135, %134 : vector<8x128xf32>
    %137 = arith.divf %135, %136 : vector<8x128xf32>
    %138 = math.tanh %132 : vector<8x128xf32>
    %139 = vector.extract_strided_slice %137 {offsets = [0, 0], sizes = [8, 32], strides = [1, 1]} : vector<8x128xf32> to vector<8x32xf32>
    %140 = vector.extract_strided_slice %137 {offsets = [0, 32], sizes = [8, 32], strides = [1, 1]} : vector<8x128xf32> to vector<8x32xf32>
    %141 = vector.extract_strided_slice %138 {offsets = [0, 64], sizes = [8, 32], strides = [1, 1]} : vector<8x128xf32> to vector<8x32xf32>
    %142 = vector.extract_strided_slice %137 {offsets = [0, 96], sizes = [8, 32], strides = [1, 1]} : vector<8x128xf32> to vector<8x32xf32>
    %143 = arith.mulf %140, %105 : vector<8x32xf32>
    %144 = arith.mulf %139, %141 : vector<8x32xf32>
    %145 = arith.addf %143, %144 : vector<8x32xf32>
    %146 = math.tanh %145 : vector<8x32xf32>
    %147 = arith.mulf %142, %146 : vector<8x32xf32>
    %148 = arith.truncf %147 : vector<8x32xf32> to vector<8x32xbf16>
    %cst_25 = arith.constant dense<0.000000e+00> : vector<8x256xf32>
    %149 = tpu.matmul %148, %6, %cst_25 {dimension_numbers = #tpu.dot_dimension_numbers<[1], [0], [0], [1], [0, 0, 1, 1], [], []>} : vector<8x32xbf16>, vector<32x256xbf16>, vector<8x256xf32> -> vector<8x256xf32>
    %150 = arith.truncf %129 : vector<8x32xf32> to vector<8x32xbf16>
    %cst_26 = arith.constant dense<0.000000e+00> : vector<8x128xf32>
    %151 = tpu.matmul %150, %7, %cst_26 {dimension_numbers = #tpu.dot_dimension_numbers<[1], [0], [0], [1], [0, 0, 1, 1], [], []>} : vector<8x32xbf16>, vector<32x128xbf16>, vector<8x128xf32> -> vector<8x128xf32>
    %152 = vector.extract_strided_slice %149 {offsets = [0, 128], sizes = [8, 128], strides = [1, 1]} : vector<8x256xf32> to vector<8x128xf32>
    %153 = arith.addf %152, %151 : vector<8x128xf32>
    %154 = arith.addf %153, %10 : vector<8x128xf32>
    %155 = arith.negf %154 : vector<8x128xf32>
    %156 = math.exp %155 : vector<8x128xf32>
    %cst_27 = arith.constant 1.000000e+00 : f32
    %157 = vector.broadcast %cst_27 : f32 to vector<8x128xf32>
    %158 = arith.addf %157, %156 : vector<8x128xf32>
    %159 = arith.divf %157, %158 : vector<8x128xf32>
    %160 = math.tanh %154 : vector<8x128xf32>
    %161 = vector.extract_strided_slice %159 {offsets = [0, 0], sizes = [8, 32], strides = [1, 1]} : vector<8x128xf32> to vector<8x32xf32>
    %162 = vector.extract_strided_slice %159 {offsets = [0, 32], sizes = [8, 32], strides = [1, 1]} : vector<8x128xf32> to vector<8x32xf32>
    %163 = vector.extract_strided_slice %160 {offsets = [0, 64], sizes = [8, 32], strides = [1, 1]} : vector<8x128xf32> to vector<8x32xf32>
    %164 = vector.extract_strided_slice %159 {offsets = [0, 96], sizes = [8, 32], strides = [1, 1]} : vector<8x128xf32> to vector<8x32xf32>
    %165 = arith.mulf %162, %127 : vector<8x32xf32>
    %166 = arith.mulf %161, %163 : vector<8x32xf32>
    %167 = arith.addf %165, %166 : vector<8x32xf32>
    %168 = math.tanh %167 : vector<8x32xf32>
    %169 = arith.mulf %164, %168 : vector<8x32xf32>
    %170 = vector.extract_strided_slice %149 {offsets = [0, 0], sizes = [8, 128], strides = [1, 1]} : vector<8x256xf32> to vector<8x128xf32>
    %171 = vector.extract_strided_slice %5 {offsets = [32, 0], sizes = [8, 128], strides = [1, 1]} : vector<64x128xf32> to vector<8x128xf32>
    %172 = arith.addf %170, %171 : vector<8x128xf32>
    %173 = arith.negf %172 : vector<8x128xf32>
    %174 = math.exp %173 : vector<8x128xf32>
    %cst_28 = arith.constant 1.000000e+00 : f32
    %175 = vector.broadcast %cst_28 : f32 to vector<8x128xf32>
    %176 = arith.addf %175, %174 : vector<8x128xf32>
    %177 = arith.divf %175, %176 : vector<8x128xf32>
    %178 = math.tanh %172 : vector<8x128xf32>
    %179 = vector.extract_strided_slice %177 {offsets = [0, 0], sizes = [8, 32], strides = [1, 1]} : vector<8x128xf32> to vector<8x32xf32>
    %180 = vector.extract_strided_slice %177 {offsets = [0, 32], sizes = [8, 32], strides = [1, 1]} : vector<8x128xf32> to vector<8x32xf32>
    %181 = vector.extract_strided_slice %178 {offsets = [0, 64], sizes = [8, 32], strides = [1, 1]} : vector<8x128xf32> to vector<8x32xf32>
    %182 = vector.extract_strided_slice %177 {offsets = [0, 96], sizes = [8, 32], strides = [1, 1]} : vector<8x128xf32> to vector<8x32xf32>
    %183 = arith.mulf %180, %145 : vector<8x32xf32>
    %184 = arith.mulf %179, %181 : vector<8x32xf32>
    %185 = arith.addf %183, %184 : vector<8x32xf32>
    %186 = math.tanh %185 : vector<8x32xf32>
    %187 = arith.mulf %182, %186 : vector<8x32xf32>
    %188 = arith.truncf %187 : vector<8x32xf32> to vector<8x32xbf16>
    %cst_29 = arith.constant dense<0.000000e+00> : vector<8x256xf32>
    %189 = tpu.matmul %188, %6, %cst_29 {dimension_numbers = #tpu.dot_dimension_numbers<[1], [0], [0], [1], [0, 0, 1, 1], [], []>} : vector<8x32xbf16>, vector<32x256xbf16>, vector<8x256xf32> -> vector<8x256xf32>
    %190 = arith.truncf %169 : vector<8x32xf32> to vector<8x32xbf16>
    %cst_30 = arith.constant dense<0.000000e+00> : vector<8x128xf32>
    %191 = tpu.matmul %190, %7, %cst_30 {dimension_numbers = #tpu.dot_dimension_numbers<[1], [0], [0], [1], [0, 0, 1, 1], [], []>} : vector<8x32xbf16>, vector<32x128xbf16>, vector<8x128xf32> -> vector<8x128xf32>
    %192 = vector.extract_strided_slice %189 {offsets = [0, 128], sizes = [8, 128], strides = [1, 1]} : vector<8x256xf32> to vector<8x128xf32>
    %193 = arith.addf %192, %191 : vector<8x128xf32>
    %194 = arith.addf %193, %10 : vector<8x128xf32>
    %195 = arith.negf %194 : vector<8x128xf32>
    %196 = math.exp %195 : vector<8x128xf32>
    %cst_31 = arith.constant 1.000000e+00 : f32
    %197 = vector.broadcast %cst_31 : f32 to vector<8x128xf32>
    %198 = arith.addf %197, %196 : vector<8x128xf32>
    %199 = arith.divf %197, %198 : vector<8x128xf32>
    %200 = math.tanh %194 : vector<8x128xf32>
    %201 = vector.extract_strided_slice %199 {offsets = [0, 0], sizes = [8, 32], strides = [1, 1]} : vector<8x128xf32> to vector<8x32xf32>
    %202 = vector.extract_strided_slice %199 {offsets = [0, 32], sizes = [8, 32], strides = [1, 1]} : vector<8x128xf32> to vector<8x32xf32>
    %203 = vector.extract_strided_slice %200 {offsets = [0, 64], sizes = [8, 32], strides = [1, 1]} : vector<8x128xf32> to vector<8x32xf32>
    %204 = vector.extract_strided_slice %199 {offsets = [0, 96], sizes = [8, 32], strides = [1, 1]} : vector<8x128xf32> to vector<8x32xf32>
    %205 = arith.mulf %202, %167 : vector<8x32xf32>
    %206 = arith.mulf %201, %203 : vector<8x32xf32>
    %207 = arith.addf %205, %206 : vector<8x32xf32>
    %208 = math.tanh %207 : vector<8x32xf32>
    %209 = arith.mulf %204, %208 : vector<8x32xf32>
    %210 = vector.extract_strided_slice %189 {offsets = [0, 0], sizes = [8, 128], strides = [1, 1]} : vector<8x256xf32> to vector<8x128xf32>
    %211 = vector.extract_strided_slice %5 {offsets = [40, 0], sizes = [8, 128], strides = [1, 1]} : vector<64x128xf32> to vector<8x128xf32>
    %212 = arith.addf %210, %211 : vector<8x128xf32>
    %213 = arith.negf %212 : vector<8x128xf32>
    %214 = math.exp %213 : vector<8x128xf32>
    %cst_32 = arith.constant 1.000000e+00 : f32
    %215 = vector.broadcast %cst_32 : f32 to vector<8x128xf32>
    %216 = arith.addf %215, %214 : vector<8x128xf32>
    %217 = arith.divf %215, %216 : vector<8x128xf32>
    %218 = math.tanh %212 : vector<8x128xf32>
    %219 = vector.extract_strided_slice %217 {offsets = [0, 0], sizes = [8, 32], strides = [1, 1]} : vector<8x128xf32> to vector<8x32xf32>
    %220 = vector.extract_strided_slice %217 {offsets = [0, 32], sizes = [8, 32], strides = [1, 1]} : vector<8x128xf32> to vector<8x32xf32>
    %221 = vector.extract_strided_slice %218 {offsets = [0, 64], sizes = [8, 32], strides = [1, 1]} : vector<8x128xf32> to vector<8x32xf32>
    %222 = vector.extract_strided_slice %217 {offsets = [0, 96], sizes = [8, 32], strides = [1, 1]} : vector<8x128xf32> to vector<8x32xf32>
    %223 = arith.mulf %220, %185 : vector<8x32xf32>
    %224 = arith.mulf %219, %221 : vector<8x32xf32>
    %225 = arith.addf %223, %224 : vector<8x32xf32>
    %226 = math.tanh %225 : vector<8x32xf32>
    %227 = arith.mulf %222, %226 : vector<8x32xf32>
    %228 = arith.truncf %227 : vector<8x32xf32> to vector<8x32xbf16>
    %cst_33 = arith.constant dense<0.000000e+00> : vector<8x256xf32>
    %229 = tpu.matmul %228, %6, %cst_33 {dimension_numbers = #tpu.dot_dimension_numbers<[1], [0], [0], [1], [0, 0, 1, 1], [], []>} : vector<8x32xbf16>, vector<32x256xbf16>, vector<8x256xf32> -> vector<8x256xf32>
    %230 = arith.truncf %209 : vector<8x32xf32> to vector<8x32xbf16>
    %cst_34 = arith.constant dense<0.000000e+00> : vector<8x128xf32>
    %231 = tpu.matmul %230, %7, %cst_34 {dimension_numbers = #tpu.dot_dimension_numbers<[1], [0], [0], [1], [0, 0, 1, 1], [], []>} : vector<8x32xbf16>, vector<32x128xbf16>, vector<8x128xf32> -> vector<8x128xf32>
    %232 = vector.extract_strided_slice %229 {offsets = [0, 128], sizes = [8, 128], strides = [1, 1]} : vector<8x256xf32> to vector<8x128xf32>
    %233 = arith.addf %232, %231 : vector<8x128xf32>
    %234 = arith.addf %233, %10 : vector<8x128xf32>
    %235 = arith.negf %234 : vector<8x128xf32>
    %236 = math.exp %235 : vector<8x128xf32>
    %cst_35 = arith.constant 1.000000e+00 : f32
    %237 = vector.broadcast %cst_35 : f32 to vector<8x128xf32>
    %238 = arith.addf %237, %236 : vector<8x128xf32>
    %239 = arith.divf %237, %238 : vector<8x128xf32>
    %240 = math.tanh %234 : vector<8x128xf32>
    %241 = vector.extract_strided_slice %239 {offsets = [0, 0], sizes = [8, 32], strides = [1, 1]} : vector<8x128xf32> to vector<8x32xf32>
    %242 = vector.extract_strided_slice %239 {offsets = [0, 32], sizes = [8, 32], strides = [1, 1]} : vector<8x128xf32> to vector<8x32xf32>
    %243 = vector.extract_strided_slice %240 {offsets = [0, 64], sizes = [8, 32], strides = [1, 1]} : vector<8x128xf32> to vector<8x32xf32>
    %244 = vector.extract_strided_slice %239 {offsets = [0, 96], sizes = [8, 32], strides = [1, 1]} : vector<8x128xf32> to vector<8x32xf32>
    %245 = arith.mulf %242, %207 : vector<8x32xf32>
    %246 = arith.mulf %241, %243 : vector<8x32xf32>
    %247 = arith.addf %245, %246 : vector<8x32xf32>
    %248 = math.tanh %247 : vector<8x32xf32>
    %249 = arith.mulf %244, %248 : vector<8x32xf32>
    %250 = vector.extract_strided_slice %229 {offsets = [0, 0], sizes = [8, 128], strides = [1, 1]} : vector<8x256xf32> to vector<8x128xf32>
    %251 = vector.extract_strided_slice %5 {offsets = [48, 0], sizes = [8, 128], strides = [1, 1]} : vector<64x128xf32> to vector<8x128xf32>
    %252 = arith.addf %250, %251 : vector<8x128xf32>
    %253 = arith.negf %252 : vector<8x128xf32>
    %254 = math.exp %253 : vector<8x128xf32>
    %cst_36 = arith.constant 1.000000e+00 : f32
    %255 = vector.broadcast %cst_36 : f32 to vector<8x128xf32>
    %256 = arith.addf %255, %254 : vector<8x128xf32>
    %257 = arith.divf %255, %256 : vector<8x128xf32>
    %258 = math.tanh %252 : vector<8x128xf32>
    %259 = vector.extract_strided_slice %257 {offsets = [0, 0], sizes = [8, 32], strides = [1, 1]} : vector<8x128xf32> to vector<8x32xf32>
    %260 = vector.extract_strided_slice %257 {offsets = [0, 32], sizes = [8, 32], strides = [1, 1]} : vector<8x128xf32> to vector<8x32xf32>
    %261 = vector.extract_strided_slice %258 {offsets = [0, 64], sizes = [8, 32], strides = [1, 1]} : vector<8x128xf32> to vector<8x32xf32>
    %262 = vector.extract_strided_slice %257 {offsets = [0, 96], sizes = [8, 32], strides = [1, 1]} : vector<8x128xf32> to vector<8x32xf32>
    %263 = arith.mulf %260, %225 : vector<8x32xf32>
    %264 = arith.mulf %259, %261 : vector<8x32xf32>
    %265 = arith.addf %263, %264 : vector<8x32xf32>
    %266 = math.tanh %265 : vector<8x32xf32>
    %267 = arith.mulf %262, %266 : vector<8x32xf32>
    %268 = arith.truncf %267 : vector<8x32xf32> to vector<8x32xbf16>
    %cst_37 = arith.constant dense<0.000000e+00> : vector<8x256xf32>
    %269 = tpu.matmul %268, %6, %cst_37 {dimension_numbers = #tpu.dot_dimension_numbers<[1], [0], [0], [1], [0, 0, 1, 1], [], []>} : vector<8x32xbf16>, vector<32x256xbf16>, vector<8x256xf32> -> vector<8x256xf32>
    %270 = arith.truncf %249 : vector<8x32xf32> to vector<8x32xbf16>
    %cst_38 = arith.constant dense<0.000000e+00> : vector<8x128xf32>
    %271 = tpu.matmul %270, %7, %cst_38 {dimension_numbers = #tpu.dot_dimension_numbers<[1], [0], [0], [1], [0, 0, 1, 1], [], []>} : vector<8x32xbf16>, vector<32x128xbf16>, vector<8x128xf32> -> vector<8x128xf32>
    %272 = vector.extract_strided_slice %269 {offsets = [0, 128], sizes = [8, 128], strides = [1, 1]} : vector<8x256xf32> to vector<8x128xf32>
    %273 = arith.addf %272, %271 : vector<8x128xf32>
    %274 = arith.addf %273, %10 : vector<8x128xf32>
    %275 = arith.negf %274 : vector<8x128xf32>
    %276 = math.exp %275 : vector<8x128xf32>
    %cst_39 = arith.constant 1.000000e+00 : f32
    %277 = vector.broadcast %cst_39 : f32 to vector<8x128xf32>
    %278 = arith.addf %277, %276 : vector<8x128xf32>
    %279 = arith.divf %277, %278 : vector<8x128xf32>
    %280 = math.tanh %274 : vector<8x128xf32>
    %281 = vector.extract_strided_slice %279 {offsets = [0, 0], sizes = [8, 32], strides = [1, 1]} : vector<8x128xf32> to vector<8x32xf32>
    %282 = vector.extract_strided_slice %279 {offsets = [0, 32], sizes = [8, 32], strides = [1, 1]} : vector<8x128xf32> to vector<8x32xf32>
    %283 = vector.extract_strided_slice %280 {offsets = [0, 64], sizes = [8, 32], strides = [1, 1]} : vector<8x128xf32> to vector<8x32xf32>
    %284 = vector.extract_strided_slice %279 {offsets = [0, 96], sizes = [8, 32], strides = [1, 1]} : vector<8x128xf32> to vector<8x32xf32>
    %285 = arith.mulf %282, %247 : vector<8x32xf32>
    %286 = arith.mulf %281, %283 : vector<8x32xf32>
    %287 = arith.addf %285, %286 : vector<8x32xf32>
    %288 = math.tanh %287 : vector<8x32xf32>
    %289 = arith.mulf %284, %288 : vector<8x32xf32>
    %290 = vector.extract_strided_slice %269 {offsets = [0, 0], sizes = [8, 128], strides = [1, 1]} : vector<8x256xf32> to vector<8x128xf32>
    %291 = vector.extract_strided_slice %5 {offsets = [56, 0], sizes = [8, 128], strides = [1, 1]} : vector<64x128xf32> to vector<8x128xf32>
    %292 = arith.addf %290, %291 : vector<8x128xf32>
    %293 = arith.negf %292 : vector<8x128xf32>
    %294 = math.exp %293 : vector<8x128xf32>
    %cst_40 = arith.constant 1.000000e+00 : f32
    %295 = vector.broadcast %cst_40 : f32 to vector<8x128xf32>
    %296 = arith.addf %295, %294 : vector<8x128xf32>
    %297 = arith.divf %295, %296 : vector<8x128xf32>
    %298 = math.tanh %292 : vector<8x128xf32>
    %299 = vector.extract_strided_slice %297 {offsets = [0, 0], sizes = [8, 32], strides = [1, 1]} : vector<8x128xf32> to vector<8x32xf32>
    %300 = vector.extract_strided_slice %297 {offsets = [0, 32], sizes = [8, 32], strides = [1, 1]} : vector<8x128xf32> to vector<8x32xf32>
    %301 = vector.extract_strided_slice %298 {offsets = [0, 64], sizes = [8, 32], strides = [1, 1]} : vector<8x128xf32> to vector<8x32xf32>
    %302 = vector.extract_strided_slice %297 {offsets = [0, 96], sizes = [8, 32], strides = [1, 1]} : vector<8x128xf32> to vector<8x32xf32>
    %303 = arith.mulf %300, %265 : vector<8x32xf32>
    %304 = arith.mulf %299, %301 : vector<8x32xf32>
    %305 = arith.addf %303, %304 : vector<8x32xf32>
    %306 = math.tanh %305 : vector<8x32xf32>
    %307 = arith.mulf %302, %306 : vector<8x32xf32>
    %308 = arith.truncf %307 : vector<8x32xf32> to vector<8x32xbf16>
    %cst_41 = arith.constant dense<0.000000e+00> : vector<8x256xf32>
    %309 = tpu.matmul %308, %6, %cst_41 {dimension_numbers = #tpu.dot_dimension_numbers<[1], [0], [0], [1], [0, 0, 1, 1], [], []>} : vector<8x32xbf16>, vector<32x256xbf16>, vector<8x256xf32> -> vector<8x256xf32>
    %310 = vector.extract_strided_slice %309 {offsets = [0, 128], sizes = [8, 128], strides = [1, 1]} : vector<8x256xf32> to vector<8x128xf32>
    %311 = arith.truncf %289 : vector<8x32xf32> to vector<8x32xbf16>
    %cst_42 = arith.constant dense<0.000000e+00> : vector<8x128xf32>
    %312 = tpu.matmul %311, %7, %cst_42 {dimension_numbers = #tpu.dot_dimension_numbers<[1], [0], [0], [1], [0, 0, 1, 1], [], []>} : vector<8x32xbf16>, vector<32x128xbf16>, vector<8x128xf32> -> vector<8x128xf32>
    %313 = arith.addf %310, %312 : vector<8x128xf32>
    %314 = arith.addf %313, %10 : vector<8x128xf32>
    %315 = arith.negf %314 : vector<8x128xf32>
    %316 = math.exp %315 : vector<8x128xf32>
    %cst_43 = arith.constant 1.000000e+00 : f32
    %317 = vector.broadcast %cst_43 : f32 to vector<8x128xf32>
    %318 = arith.addf %317, %316 : vector<8x128xf32>
    %319 = arith.divf %317, %318 : vector<8x128xf32>
    %320 = math.tanh %314 : vector<8x128xf32>
    %321 = vector.extract_strided_slice %319 {offsets = [0, 0], sizes = [8, 32], strides = [1, 1]} : vector<8x128xf32> to vector<8x32xf32>
    %322 = vector.extract_strided_slice %319 {offsets = [0, 32], sizes = [8, 32], strides = [1, 1]} : vector<8x128xf32> to vector<8x32xf32>
    %323 = vector.extract_strided_slice %320 {offsets = [0, 64], sizes = [8, 32], strides = [1, 1]} : vector<8x128xf32> to vector<8x32xf32>
    %324 = vector.extract_strided_slice %319 {offsets = [0, 96], sizes = [8, 32], strides = [1, 1]} : vector<8x128xf32> to vector<8x32xf32>
    %325 = arith.mulf %322, %287 : vector<8x32xf32>
    %326 = arith.mulf %321, %323 : vector<8x32xf32>
    %327 = arith.addf %325, %326 : vector<8x32xf32>
    %328 = math.tanh %327 : vector<8x32xf32>
    %329 = arith.mulf %324, %328 : vector<8x32xf32>
    %c0_44 = arith.constant 0 : index
    %c0_45 = arith.constant 0 : index
    %330 = vector.load %arg6[%c0_44, %c0_45] : memref<32x12xf32, #tpu.memory_space<vmem>>, vector<32x12xf32>
    %cst_46 = arith.constant dense<0.000000e+00> : vector<8x12xf32>
    %331 = tpu.matmul %329, %330, %cst_46 {dimension_numbers = #tpu.dot_dimension_numbers<[1], [0], [0], [1], [0, 0, 1, 1], [], []>} : vector<8x32xf32>, vector<32x12xf32>, vector<8x12xf32> -> vector<8x12xf32>
    %c0_47 = arith.constant 0 : index
    %c0_48 = arith.constant 0 : index
    %332 = vector.load %arg7[%c0_47, %c0_48] : memref<1x12xf32, #tpu.memory_space<vmem>>, vector<1x12xf32>
    %333 = vector.broadcast %332 : vector<1x12xf32> to vector<8x12xf32>
    %334 = arith.addf %331, %333 : vector<8x12xf32>
    %c0_49 = arith.constant 0 : index
    %c0_50 = arith.constant 0 : index
    %335 = vector.load %arg8[%c0_49, %c0_50] : memref<8x12xf32, #tpu.memory_space<vmem>>, vector<8x12xf32>
    tpu.vector_store %arg8[%c0_49, %c0_50], %334 {strides = array<i32>} : memref<8x12xf32, #tpu.memory_space<vmem>>, vector<8x12xf32>,
    return
  }
}

</mosaic_0001>

<bundles_post_ra>
// kernel: tpu_custom_call.1
= control target key start
LH: loop header
LB: loop body
LE: loop exit
PB: predicated region body
PF: predicated region fallthrough
CT: control target
= control target key end

     0   :  { %vm73_vm0 = vcmask 1045504   ;;  %vm1854_vm1 = vmmov 1   ;;  %vm48_vm3 = vcmask 113664   ;;  %s2266_s0 = inlined_call_operand.vmem [shape: f32[64,14], index: 0, kind: input, shape index: {}]   ;;  %s2267_s1 = inlined_call_operand.vmem [shape: f32[14,128], index: 1, kind: input, shape index: {}]   ;;  %s2268_s2 = inlined_call_operand.vmem [shape: f32[1,128], index: 2, kind: input, shape index: {}]   ;;  %s2269_s3 = inlined_call_operand.vmem [shape: bf16[32,256], index: 3, kind: input, shape index: {}]   ;;  %s2270_s4 = inlined_call_operand.vmem [shape: bf16[32,128], index: 4, kind: input, shape index: {}]   ;;  %s2271_s5 = inlined_call_operand.vmem [shape: f32[1,128], index: 5, kind: input, shape index: {}]   ;;  %s2272_s6 = inlined_call_operand.vmem [shape: f32[32,12], index: 6, kind: input, shape index: {}]   ;;  %s2273_s7 = inlined_call_operand.vmem [shape: f32[1,12], index: 7, kind: input, shape index: {}]   ;;  %s2274_s8 = inlined_call_operand.hbm [shape: f32[8,12], index: 8, kind: output, shape index: {}]  }
   0x1   :  { %v39_v0 = vld [vmem:[%s2267_s1] sm:$0xff]  ;;  %v40_v1 = vld [vmem:[%s2267_s1 + $0x8] sm:$0x3f]  ;;  %vm1675_vm2 = vmpackc.low %vm73_vm0, %vm1854_vm1 }
   0x2   :  { %v31_v2 = vld [vmem:[%s2266_s0] sm:$0xff]  ;;  %v1674_v3 = vpack.c.bf16 %v40_v1, %v39_v0  ;;  %v32_v4 = vld [vmem:[%s2266_s0 + $0x8] sm:$0xff] }
   0x3   :  { %1587 = vmatprep.mubr.msk.f32.mxu0 %vm48_vm3, %v31_v2 }
   0x4   :  { %1676 = vmatprep.subr.msk.bf16.mxu0 %vm1675_vm2, %v1674_v3 }
   0x5   :  { %1679 = vmatpush3.bf16.msk.msra.mxu0 %vm1675_vm2, %v1674_v3 }
   0x6   :  { %13 = vsyncpa [#allocation3], 0  ;;  %v1924_v5 = vld [vmem:[%s2268_s2] ss:$0 sm:$0xff]  ;;  %s1855_s14 = smov 64   ;;  %s1856_s15 = smov 32  }
   0x7   :  { %v1935_v19 = vld [vmem:[%s2269_s3 + $0x4] ss:$8 sps:$4 sm:$0xff]   ;;  %v1940_v20 = vld [vmem:[%s2269_s3] ss:$8 sps:$4 sm:$0xff]   ;;  %v1945_v21 = vld [vmem:[%s2269_s3 + $0x14] ss:$8 sps:$4 sm:$0xff]  }
   0x8   :  { %1588 = vmatmul.mubr.msk.f32.vlgmr.msra.gmra.mrb[0].mxu0 %vm48_vm3, %v32_v4  ;;  %249 = vmatprep.subr.bf16.mxu1 %v1935_v19  ;;  %v1857_v22 = vmov 0   ;;  %v1953_v23 = vld [vmem:[%s2269_s3 + $0x10] ss:$8 sps:$4 sm:$0xff]   ;;  %v1858_v25 = vmov 0.0   ;;  %vm245_vm4 = vcmask 261120   ;;  %v1968_v29 = vld [vmem:[%s2270_s4] sm:$0xff]  }
   0x9   :  { %281 = vmatprep.mubr.bf16.mxu1 %v1857_v22  ;;  %250 = vmatpush1.bf16.msra.mxu1 %v1940_v20  ;;  %v1975_v31 = vld [vmem:[%s2270_s4 + $0x8] sm:$0xff]   ;;  %vm1859_vm5 = vmmov 0   ;;  %v1993_v38 = vld [vmem:[%s2271_s5] ss:$0 sm:$0xff]  ;;  %v33_v2 = vld [vmem:[%s2266_s0 + $0x10] sm:$0xff]  ;;  %s1861_s24 = smov [#allocation2]  }
   0xa   :  { %403 = vmatprep.subr.bf16.mxu0 %v1935_v19  ;;  %251 = vmatprep.subr.bf16.mxu1 %v1945_v21  ;;  %v34_v3 = vld [vmem:[%s2266_s0 + $0x18] sm:$0xff]  ;;  %v35_v4 = vld [vmem:[%s2266_s0 + $0x20] sm:$0xff]  ;;  %vm1478_vm6 = vcmask 97280  }
   0xb   :  { %404 = vmatpush1.bf16.msra.mxu0 %v1940_v20  ;;  %1590 = vmatprep.mubr.msk.f32.mxu0 %vm48_vm3, %v33_v2 }
   0xc   :  { %405 = vmatprep.subr.bf16.mxu0 %v1945_v21  ;;  %1591 = vmatmul.mubr.msk.f32.gmra.mrb[2].mxu0 %vm48_vm3, %v34_v3 }
   0xd   :  { %252 = vmatpush1.bf16.msra.mxu1 %v1953_v23  ;;  %1593 = vmatprep.mubr.msk.f32.mxu0 %vm48_vm3, %v35_v4 }
   0xe   :  { %1599 = vmatprep.subr.bf16.mxu1 %v1858_v25 }
   0xf   :  { %406 = vmatpush1.bf16.msra.mxu0 %v1953_v23 }
  0x10   :  { %549 = vmatprep.subr.bf16.mxu0 %v1935_v19 }
  0xdb   :  { %v1589_v6 = vpop.f32.mrb[0].mxu0 }
  0xdc   :  { %v143_v7 = vpop.f32.mrb[1].mxu0  ;;  %v149_v32 = vadd.f32 %v1589_v6, %v1924_v5  ;;  %v36_v6 = vld [vmem:[%s2266_s0 + $0x28] sm:$0xff] }
  0xdd   :  { %v144_v8 = vadd.f32 %v1924_v5, %v143_v7  ;;  %v37_v7 = vld [vmem:[%s2266_s0 + $0x30] sm:$0xff]  ;;  %1594 = vmatmul.mubr.msk.f32.gmra.mrb[4].mxu0 %vm48_vm3, %v36_v6 }
  0xde   :  { %1596 = vmatprep.mubr.msk.f32.mxu0 %vm48_vm3, %v37_v7 }
  0xdf   :  { %1702 = vtanh.f32 %v144_v8  ;;  %v1505_v10 = vmul.f32 -1.442695, %v144_v8  ;;  %v38_v8 = vld [vmem:[%s2266_s0 + $0x38] sm:$0xff] }
  0xe1   :  { %1704 = vpow2.f32 %v1505_v10  ;;  %1597 = vmatmul.mubr.msk.f32.gmra.mrb[6].mxu0 %vm48_vm3, %v38_v8 }
  0xe2   :  { %435 = vmatprep.mubr.bf16.mxu0 %v1857_v22 }
  0xe9   :  { %v1703_v9 = vpop.eup %1702 }
  0xea   :  { %206 = vrot.lane.b32.xlu0 %v1703_v9, %s1855_s14 }
  0xeb   :  { %v1705_v11 = vpop.eup %1704 }
  0xec   :  { %v200_v12 = vadd.f32 1.0, %v1705_v11 }
  0xee   :  { %1706 = vrcp.f32 %v200_v12 }
  0xf8   :  { %v1707_v13 = vpop.eup %1706 }
  0xf9   :  { %v204_v16 = vmul.f32 0.0, %v1707_v13 }
 0x15c   :  { %v207_v14 = vpop.permute.xlu0 %206 }
 0x15d   :  { %v209_v15 = vmul.f32 %v1707_v13, %v207_v14 }
 0x15f   :  { %211 = vrot.lane.b32.xlu0 %v209_v15, %s1856_s15 }
 0x1d1   :  { %v212_v17 = vpop.permute.xlu0 %211 }
 0x1d2   :  { %v1929_v18 = vadd.f32 %v212_v17, %v204_v16  ;;  %v2036_v16 = vpop.f32.mrb[2].mxu0 }
 0x1d3   :  { %v153_v17 = vpop.f32.mrb[3].mxu0 }
 0x1d4   :  { %1708 = vtanh.f32 %v1929_v18 }
 0x1de   :  { %v1709_v24 = vpop.eup %1708 }
 0x1df   :  { %217 = vrot.lane.b32.xlu1 %v1709_v24, %s1855_s14 }
 0x251   :  { %v218_v26 = vpop.permute.xlu1 %217 }
 0x252   :  { %v220_v27 = vmul.f32 %v1707_v13, %v218_v26 }
 0x254   :  { %v221_v28 = vpack.c.bf16 %v220_v27, %v220_v27 }
 0x256   :  { %223 = vrot.lane.b32.xlu1 %v221_v28, %s1856_s15 }
 0x2c8   :  { %v224_v30 = vpop.permute.xlu1 %223 }
 0x2c9   :  { %1510 = vmatmul.mubr.msk.bf16.vlgmr.msra.gmra.mrb[0].mxu1 %vm245_vm4, %v224_v30 }
 0x2ca   :  { %1600 = vmatpush3.bf16.msra.mxu1 %v1968_v29  ;;  %1603 = vmatprep.mubr.msk.bf16.mxu1 %vm1859_vm5, %v1858_v25 }
 0x2cb   :  { %1601 = vmatprep.subr.bf16.mxu1 %v1858_v25 }
 0x2ce   :  { %1602 = vmatpush3.bf16.msra.mxu1 %v1975_v31 }
 0x2cf   :  { %1607 = vmatprep.subr.bf16.mxu1 %v1858_v25 }
 0x2d1   :  { %1604 = vmatmul.mubr.bf16.vlgmr.msra.gmra.mrb[4].mxu1 %v1857_v22 }
 0x2d2   :  { %1608 = vmatpush3.bf16.msra.mxu1 %v1968_v29  ;;  %1611 = vmatprep.mubr.msk.bf16.mxu1 %vm1859_vm5, %v1858_v25 }
 0x2d3   :  { %1609 = vmatprep.subr.bf16.mxu1 %v1858_v25 }
 0x2d6   :  { %1610 = vmatpush3.bf16.msra.mxu1 %v1975_v31 }
 0x2d7   :  { %1615 = vmatprep.subr.bf16.mxu1 %v1858_v25 }
 0x39c   :  { %v283_v33 = vpop.f32.mrb[0].mxu1 }
 0x39d   :  { %v371_v34 = vadd.f32 %v283_v33, %v149_v32  ;;  %v285_v35 = vpop.f32.mrb[1].mxu1  ;;  %v154_v32 = vadd.f32 %v1924_v5, %v153_v17 }
 0x39e   :  { %v287_v36 = vpop.f32.mrb[2].mxu1 }
 0x39f   :  { %1710 = vtanh.f32 %v371_v34  ;;  %v288_v37 = vpop.f32.mrb[3].mxu1  ;;  %v1514_v47 = vmul.f32 -1.442695, %v371_v34 }
 0x3a4   :  { %v339_v39 = vpop.f32.mrb[4].mxu1 }
 0x3a5   :  { %v345_v40 = vadd.f32 %v339_v39, %v285_v35  ;;  %v1605_v41 = vpop.f32.mrb[5].mxu1 }
 0x3a6   :  { %v342_v42 = vpop.f32.mrb[6].mxu1 }
 0x3a7   :  { %v346_v43 = vadd.f32 %v1993_v38, %v345_v40  ;;  %v1606_v44 = vpop.f32.mrb[7].mxu1 }
 0x3a9   :  { %v1711_v45 = vpop.eup %1710  ;;  %1712 = vtanh.f32 %v346_v43  ;;  %v1513_v48 = vmul.f32 -1.442695, %v346_v43 }
 0x3aa   :  { %381 = vrot.lane.b32.xlu0 %v1711_v45, %s1855_s14  ;;  %1714 = vpow2.f32 %v1514_v47 }
 0x3ab   :  { %1716 = vpow2.f32 %v1513_v48 }
 0x3b3   :  { %v1713_v46 = vpop.eup %1712 }
 0x3b4   :  { %356 = vrot.lane.b32.xlu1 %v1713_v46, %s1855_s14  ;;  %v1715_v49 = vpop.eup %1714 }
 0x3b5   :  { %v375_v50 = vadd.f32 1.0, %v1715_v49  ;;  %v1717_v51 = vpop.eup %1716 }
 0x3b6   :  { %v350_v52 = vadd.f32 1.0, %v1717_v51 }
 0x3b7   :  { %1718 = vrcp.f32 %v375_v50 }
 0x3b8   :  { %1720 = vrcp.f32 %v350_v52 }
 0x3c1   :  { %v1719_v53 = vpop.eup %1718 }
 0x3c2   :  { %v1721_v56 = vpop.eup %1720  ;;  %v379_v59 = vmul.f32 %v1719_v53, %v1929_v18  ;;  %v2038_v18 = vpop.f32.mrb[4].mxu0 }
 0x3c3   :  { %v354_v62 = vmul.f32 0.0, %v1721_v56  ;;  %v2040_v24 = vpop.f32.mrb[5].mxu0 }
 0x3c4   :  { %v2042_v26 = vpop.f32.mrb[6].mxu0 }
 0x3c5   :  { %v2044_v27 = vpop.f32.mrb[7].mxu0 }
 0x41c   :  { %v382_v54 = vpop.permute.xlu0 %381 }
 0x41d   :  { %v384_v55 = vmul.f32 %v1719_v53, %v382_v54 }
 0x41f   :  { %386 = vrot.lane.b32.xlu0 %v384_v55, %s1856_s15 }
 0x426   :  { %v357_v57 = vpop.permute.xlu1 %356 }
 0x427   :  { %v359_v58 = vmul.f32 %v1721_v56, %v357_v57 }
 0x429   :  { %361 = vrot.lane.b32.xlu1 %v359_v58, %s1856_s15 }
 0x491   :  { %v387_v60 = vpop.permute.xlu0 %386 }
 0x492   :  { %v2001_v61 = vadd.f32 %v387_v60, %v379_v59 }
 0x494   :  { %1722 = vtanh.f32 %v2001_v61 }
 0x49b   :  { %v362_v63 = vpop.permute.xlu1 %361 }
 0x49c   :  { %v2004_v0 = vadd.f32 %v362_v63, %v354_v62 }
 0x49e   :  { %v1723_v1 = vpop.eup %1722  ;;  %1724 = vtanh.f32 %v2004_v0 }
 0x49f   :  { %392 = vrot.lane.b32.xlu0 %v1723_v1, %s1855_s14 }
 0x4a8   :  { %v1725_v9 = vpop.eup %1724 }
 0x4a9   :  { %367 = vrot.lane.b32.xlu1 %v1725_v9, %s1855_s14 }
 0x511   :  { %v393_v10 = vpop.permute.xlu0 %392 }
 0x512   :  { %v395_v11 = vmul.f32 %v1719_v53, %v393_v10 }
 0x514   :  { %v396_v12 = vpack.c.bf16 %v395_v11, %v395_v11 }
 0x516   :  { %398 = vrot.lane.b32.xlu0 %v396_v12, %s1856_s15  ;;  %v159_v12 = vadd.f32 %v2036_v16, %v1924_v5 }
 0x51b   :  { %v368_v13 = vpop.permute.xlu1 %367 }
 0x51c   :  { %v370_v14 = vmul.f32 %v1721_v56, %v368_v13 }
 0x51e   :  { %v444_v15 = vpack.c.bf16 %v370_v14, %v370_v14 }
 0x520   :  { %446 = vrot.lane.b32.xlu1 %v444_v15, %s1856_s15 }
 0x588   :  { %v399_v28 = vpop.permute.xlu0 %398 }
 0x589   :  { %1515 = vmatmul.mubr.msk.bf16.vlgmr.msra.gmra.mrb[8].mxu0 %vm245_vm4, %v399_v28 }
 0x58a   :  { %550 = vmatpush1.bf16.msra.mxu0 %v1940_v20  ;;  %581 = vmatprep.mubr.bf16.mxu0 %v1857_v22 }
 0x58b   :  { %551 = vmatprep.subr.bf16.mxu0 %v1945_v21 }
 0x58e   :  { %552 = vmatpush1.bf16.msra.mxu0 %v1953_v23 }
 0x58f   :  { %695 = vmatprep.subr.bf16.mxu0 %v1935_v19 }
 0x592   :  { %v447_v30 = vpop.permute.xlu1 %446 }
 0x593   :  { %1612 = vmatmul.mubr.msk.bf16.vlgmr.msra.gmra.mrb[8].mxu1 %vm245_vm4, %v447_v30 }
 0x594   :  { %1616 = vmatpush3.bf16.msra.mxu1 %v1968_v29  ;;  %1619 = vmatprep.mubr.msk.bf16.mxu1 %vm1859_vm5, %v1858_v25 }
 0x595   :  { %1617 = vmatprep.subr.bf16.mxu1 %v1858_v25 }
 0x598   :  { %1618 = vmatpush3.bf16.msra.mxu1 %v1975_v31 }
 0x599   :  { %1623 = vmatprep.subr.bf16.mxu1 %v1858_v25 }
 0x65c   :  { %v437_v33 = vpop.f32.mrb[8].mxu0 }
 0x65d   :  { %v517_v34 = vadd.f32 %v437_v33, %v154_v32  ;;  %v439_v35 = vpop.f32.mrb[9].mxu0 }
 0x65e   :  { %v441_v36 = vpop.f32.mrb[10].mxu0 }
 0x65f   :  { %1726 = vtanh.f32 %v517_v34  ;;  %v442_v37 = vpop.f32.mrb[11].mxu0  ;;  %v1518_v47 = vmul.f32 -1.442695, %v517_v34 }
 0x666   :  { %v485_v39 = vpop.f32.mrb[8].mxu1 }
 0x667   :  { %v491_v40 = vadd.f32 %v485_v39, %v439_v35  ;;  %v1613_v41 = vpop.f32.mrb[9].mxu1 }
 0x668   :  { %v488_v42 = vpop.f32.mrb[10].mxu1 }
 0x669   :  { %v1727_v43 = vpop.eup %1726  ;;  %v492_v44 = vadd.f32 %v1993_v38, %v491_v40  ;;  %v1614_v45 = vpop.f32.mrb[11].mxu1 }
 0x66a   :  { %527 = vrot.lane.b32.xlu0 %v1727_v43, %s1855_s14 }
 0x66b   :  { %1728 = vtanh.f32 %v492_v44  ;;  %v1517_v48 = vmul.f32 -1.442695, %v492_v44 }
 0x66c   :  { %1730 = vpow2.f32 %v1518_v47 }
 0x66d   :  { %1732 = vpow2.f32 %v1517_v48 }
 0x675   :  { %v1729_v46 = vpop.eup %1728 }
 0x676   :  { %502 = vrot.lane.b32.xlu1 %v1729_v46, %s1855_s14  ;;  %v1731_v49 = vpop.eup %1730 }
 0x677   :  { %v521_v50 = vadd.f32 1.0, %v1731_v49  ;;  %v1733_v51 = vpop.eup %1732 }
 0x678   :  { %v496_v52 = vadd.f32 1.0, %v1733_v51 }
 0x679   :  { %1734 = vrcp.f32 %v521_v50 }
 0x67a   :  { %1736 = vrcp.f32 %v496_v52 }
 0x683   :  { %v1735_v53 = vpop.eup %1734 }
 0x684   :  { %v1737_v56 = vpop.eup %1736  ;;  %v525_v59 = vmul.f32 %v1735_v53, %v2001_v61 }
 0x685   :  { %v500_v63 = vmul.f32 %v1737_v56, %v2004_v0 }
 0x6dc   :  { %v528_v54 = vpop.permute.xlu0 %527 }
 0x6dd   :  { %v530_v55 = vmul.f32 %v1735_v53, %v528_v54 }
 0x6df   :  { %532 = vrot.lane.b32.xlu0 %v530_v55, %s1856_s15 }
 0x6e8   :  { %v503_v57 = vpop.permute.xlu1 %502 }
 0x6e9   :  { %v505_v58 = vmul.f32 %v1737_v56, %v503_v57 }
 0x6eb   :  { %507 = vrot.lane.b32.xlu1 %v505_v58, %s1856_s15 }
 0x751   :  { %v533_v60 = vpop.permute.xlu0 %532 }
 0x752   :  { %v2066_v62 = vadd.f32 %v533_v60, %v525_v59 }
 0x754   :  { %1738 = vtanh.f32 %v2066_v62 }
 0x75d   :  { %v508_v1 = vpop.permute.xlu1 %507 }
 0x75e   :  { %v1739_v2 = vpop.eup %1738  ;;  %v2070_v3 = vadd.f32 %v508_v1, %v500_v63 }
 0x75f   :  { %538 = vrot.lane.b32.xlu0 %v1739_v2, %s1855_s14 }
 0x760   :  { %1740 = vtanh.f32 %v2070_v3 }
 0x76a   :  { %v1741_v4 = vpop.eup %1740 }
 0x76b   :  { %513 = vrot.lane.b32.xlu1 %v1741_v4, %s1855_s14 }
 0x7d1   :  { %v539_v6 = vpop.permute.xlu0 %538 }
 0x7d2   :  { %v541_v61 = vmul.f32 %v1735_v53, %v539_v6  ;;  %v164_v6 = vadd.f32 %v1924_v5, %v2040_v24 }
 0x7d4   :  { %v542_v7 = vpack.c.bf16 %v541_v61, %v541_v61 }
 0x7d6   :  { %544 = vrot.lane.b32.xlu0 %v542_v7, %s1856_s15 }
 0x7dd   :  { %v514_v8 = vpop.permute.xlu1 %513 }
 0x7de   :  { %v516_v9 = vmul.f32 %v1737_v56, %v514_v8 }
 0x7e0   :  { %v590_v10 = vpack.c.bf16 %v516_v9, %v516_v9 }
 0x7e2   :  { %592 = vrot.lane.b32.xlu1 %v590_v10, %s1856_s15 }
 0x848   :  { %v545_v0 = vpop.permute.xlu0 %544 }
 0x849   :  { %1519 = vmatmul.mubr.msk.bf16.vlgmr.msra.gmra.mrb[12].mxu0 %vm245_vm4, %v545_v0 }
 0x84a   :  { %696 = vmatpush1.bf16.msra.mxu0 %v1940_v20  ;;  %727 = vmatprep.mubr.bf16.mxu0 %v1857_v22 }
 0x84b   :  { %697 = vmatprep.subr.bf16.mxu0 %v1945_v21 }
 0x84e   :  { %698 = vmatpush1.bf16.msra.mxu0 %v1953_v23 }
 0x84f   :  { %841 = vmatprep.subr.bf16.mxu0 %v1935_v19 }
 0x854   :  { %v593_v11 = vpop.permute.xlu1 %592 }
 0x855   :  { %1620 = vmatmul.mubr.msk.bf16.vlgmr.msra.gmra.mrb[12].mxu1 %vm245_vm4, %v593_v11 }
 0x856   :  { %1624 = vmatpush3.bf16.msra.mxu1 %v1968_v29  ;;  %1627 = vmatprep.mubr.msk.bf16.mxu1 %vm1859_vm5, %v1858_v25 }
 0x857   :  { %1625 = vmatprep.subr.bf16.mxu1 %v1858_v25 }
 0x85a   :  { %1626 = vmatpush3.bf16.msra.mxu1 %v1975_v31 }
 0x85b   :  { %1631 = vmatprep.subr.bf16.mxu1 %v1858_v25 }
 0x91c   :  { %v583_v13 = vpop.f32.mrb[12].mxu0 }
 0x91d   :  { %v663_v14 = vadd.f32 %v583_v13, %v159_v12  ;;  %v585_v15 = vpop.f32.mrb[13].mxu0 }
 0x91e   :  { %v587_v17 = vpop.f32.mrb[14].mxu0 }
 0x91f   :  { %1742 = vtanh.f32 %v663_v14  ;;  %v588_v28 = vpop.f32.mrb[15].mxu0  ;;  %v1522_v16 = vmul.f32 -1.442695, %v663_v14 }
 0x928   :  { %v631_v30 = vpop.f32.mrb[12].mxu1 }
 0x929   :  { %v1743_v32 = vpop.eup %1742  ;;  %v637_v33 = vadd.f32 %v631_v30, %v585_v15  ;;  %v1621_v34 = vpop.f32.mrb[13].mxu1 }
 0x92a   :  { %673 = vrot.lane.b32.xlu0 %v1743_v32, %s1855_s14  ;;  %v634_v35 = vpop.f32.mrb[14].mxu1 }
 0x92b   :  { %v638_v36 = vadd.f32 %v1993_v38, %v637_v33  ;;  %v1622_v37 = vpop.f32.mrb[15].mxu1 }
 0x92d   :  { %1744 = vtanh.f32 %v638_v36  ;;  %v1521_v41 = vmul.f32 -1.442695, %v638_v36 }
 0x92e   :  { %1746 = vpow2.f32 %v1522_v16 }
 0x92f   :  { %1748 = vpow2.f32 %v1521_v41 }
 0x937   :  { %v1745_v39 = vpop.eup %1744 }
 0x938   :  { %648 = vrot.lane.b32.xlu1 %v1745_v39, %s1855_s14  ;;  %v1747_v40 = vpop.eup %1746 }
 0x939   :  { %v667_v42 = vadd.f32 1.0, %v1747_v40  ;;  %v1749_v43 = vpop.eup %1748 }
 0x93a   :  { %v642_v45 = vadd.f32 1.0, %v1749_v43 }
 0x93b   :  { %1750 = vrcp.f32 %v667_v42 }
 0x93c   :  { %1752 = vrcp.f32 %v642_v45 }
 0x945   :  { %v1751_v44 = vpop.eup %1750 }
 0x946   :  { %v1753_v48 = vpop.eup %1752  ;;  %v671_v51 = vmul.f32 %v1751_v44, %v2066_v62 }
 0x947   :  { %v646_v55 = vmul.f32 %v1753_v48, %v2070_v3 }
 0x99c   :  { %v674_v46 = vpop.permute.xlu0 %673 }
 0x99d   :  { %v676_v47 = vmul.f32 %v1751_v44, %v674_v46 }
 0x99f   :  { %678 = vrot.lane.b32.xlu0 %v676_v47, %s1856_s15 }
 0x9aa   :  { %v649_v49 = vpop.permute.xlu1 %648 }
 0x9ab   :  { %v651_v50 = vmul.f32 %v1753_v48, %v649_v49 }
 0x9ad   :  { %653 = vrot.lane.b32.xlu1 %v651_v50, %s1856_s15 }
 0xa11   :  { %v679_v52 = vpop.permute.xlu0 %678 }
 0xa12   :  { %v2098_v53 = vadd.f32 %v679_v52, %v671_v51 }
 0xa14   :  { %1754 = vtanh.f32 %v2098_v53 }
 0xa1e   :  { %v1755_v54 = vpop.eup %1754 }
 0xa1f   :  { %684 = vrot.lane.b32.xlu0 %v1755_v54, %s1855_s14  ;;  %v654_v56 = vpop.permute.xlu1 %653 }
 0xa20   :  { %v2103_v57 = vadd.f32 %v654_v56, %v646_v55 }
 0xa22   :  { %1756 = vtanh.f32 %v2103_v57 }
 0xa2c   :  { %v1757_v58 = vpop.eup %1756 }
 0xa2d   :  { %659 = vrot.lane.b32.xlu1 %v1757_v58, %s1855_s14  ;;  %v169_v58 = vadd.f32 %v2038_v18, %v1924_v5 }
 0xa91   :  { %v685_v59 = vpop.permute.xlu0 %684 }
 0xa92   :  { %v687_v60 = vmul.f32 %v1751_v44, %v685_v59 }
 0xa94   :  { %v688_v62 = vpack.c.bf16 %v687_v60, %v687_v60 }
 0xa96   :  { %690 = vrot.lane.b32.xlu0 %v688_v62, %s1856_s15 }
 0xa9f   :  { %v660_v63 = vpop.permute.xlu1 %659 }
 0xaa0   :  { %v662_v1 = vmul.f32 %v1753_v48, %v660_v63 }
 0xaa2   :  { %v736_v2 = vpack.c.bf16 %v662_v1, %v662_v1 }
 0xaa4   :  { %738 = vrot.lane.b32.xlu1 %v736_v2, %s1856_s15 }
 0xb08   :  { %v691_v3 = vpop.permute.xlu0 %690 }
 0xb09   :  { %1523 = vmatmul.mubr.msk.bf16.vlgmr.msra.gmra.mrb[16].mxu0 %vm245_vm4, %v691_v3 }
 0xb0a   :  { %842 = vmatpush1.bf16.msra.mxu0 %v1940_v20  ;;  %873 = vmatprep.mubr.bf16.mxu0 %v1857_v22 }
 0xb0b   :  { %843 = vmatprep.subr.bf16.mxu0 %v1945_v21 }
 0xb0e   :  { %844 = vmatpush1.bf16.msra.mxu0 %v1953_v23 }
 0xb0f   :  { %987 = vmatprep.subr.bf16.mxu0 %v1935_v19 }
 0xb16   :  { %v739_v4 = vpop.permute.xlu1 %738 }
 0xb17   :  { %1628 = vmatmul.mubr.msk.bf16.vlgmr.msra.gmra.mrb[16].mxu1 %vm245_vm4, %v739_v4 }
 0xb18   :  { %1632 = vmatpush3.bf16.msra.mxu1 %v1968_v29  ;;  %1635 = vmatprep.mubr.msk.bf16.mxu1 %vm1859_vm5, %v1858_v25 }
 0xb19   :  { %1633 = vmatprep.subr.bf16.mxu1 %v1858_v25 }
 0xb1c   :  { %1634 = vmatpush3.bf16.msra.mxu1 %v1975_v31 }
 0xb1d   :  { %1639 = vmatprep.subr.bf16.mxu1 %v1858_v25 }
 0xbdc   :  { %v729_v61 = vpop.f32.mrb[16].mxu0 }
 0xbdd   :  { %v809_v7 = vadd.f32 %v729_v61, %v164_v6  ;;  %v731_v8 = vpop.f32.mrb[17].mxu0 }
 0xbde   :  { %v733_v9 = vpop.f32.mrb[18].mxu0 }
 0xbdf   :  { %1758 = vtanh.f32 %v809_v7  ;;  %v734_v10 = vpop.f32.mrb[19].mxu0  ;;  %v1526_v24 = vmul.f32 -1.442695, %v809_v7 }
 0xbe9   :  { %v1759_v0 = vpop.eup %1758 }
 0xbea   :  { %819 = vrot.lane.b32.xlu0 %v1759_v0, %s1855_s14  ;;  %v777_v11 = vpop.f32.mrb[16].mxu1 }
 0xbeb   :  { %v783_v12 = vadd.f32 %v777_v11, %v731_v8  ;;  %v1629_v13 = vpop.f32.mrb[17].mxu1 }
 0xbec   :  { %v780_v14 = vpop.f32.mrb[18].mxu1 }
 0xbed   :  { %v784_v15 = vadd.f32 %v1993_v38, %v783_v12  ;;  %v1630_v17 = vpop.f32.mrb[19].mxu1 }
 0xbef   :  { %1760 = vtanh.f32 %v784_v15  ;;  %v1525_v32 = vmul.f32 -1.442695, %v784_v15 }
 0xbf0   :  { %1762 = vpow2.f32 %v1526_v24 }
 0xbf1   :  { %1764 = vpow2.f32 %v1525_v32 }
 0xbf9   :  { %v1761_v28 = vpop.eup %1760 }
 0xbfa   :  { %794 = vrot.lane.b32.xlu1 %v1761_v28, %s1855_s14  ;;  %v1763_v30 = vpop.eup %1762 }
 0xbfb   :  { %v813_v33 = vadd.f32 1.0, %v1763_v30  ;;  %v1765_v34 = vpop.eup %1764 }
 0xbfc   :  { %v788_v39 = vadd.f32 1.0, %v1765_v34 }
 0xbfd   :  { %1766 = vrcp.f32 %v813_v33 }
 0xbfe   :  { %1768 = vrcp.f32 %v788_v39 }
 0xc07   :  { %v1767_v35 = vpop.eup %1766 }
 0xc08   :  { %v1769_v16 = vpop.eup %1768  ;;  %v817_v42 = vmul.f32 %v1767_v35, %v2098_v53 }
 0xc09   :  { %v792_v46 = vmul.f32 %v1769_v16, %v2103_v57 }
 0xc5c   :  { %v820_v36 = vpop.permute.xlu0 %819 }
 0xc5d   :  { %v822_v37 = vmul.f32 %v1767_v35, %v820_v36 }
 0xc5f   :  { %824 = vrot.lane.b32.xlu0 %v822_v37, %s1856_s15 }
 0xc6c   :  { %v795_v40 = vpop.permute.xlu1 %794 }
 0xc6d   :  { %v797_v41 = vmul.f32 %v1769_v16, %v795_v40 }
 0xc6f   :  { %799 = vrot.lane.b32.xlu1 %v797_v41, %s1856_s15 }
 0xcd1   :  { %v825_v43 = vpop.permute.xlu0 %824 }
 0xcd2   :  { %v2130_v44 = vadd.f32 %v825_v43, %v817_v42 }
 0xcd4   :  { %1770 = vtanh.f32 %v2130_v44 }
 0xcde   :  { %v1771_v45 = vpop.eup %1770 }
 0xcdf   :  { %830 = vrot.lane.b32.xlu0 %v1771_v45, %s1855_s14 }
 0xce1   :  { %v800_v47 = vpop.permute.xlu1 %799 }
 0xce2   :  { %v2135_v48 = vadd.f32 %v800_v47, %v792_v46 }
 0xce4   :  { %1772 = vtanh.f32 %v2135_v48 }
 0xcee   :  { %v1773_v49 = vpop.eup %1772 }
 0xcef   :  { %805 = vrot.lane.b32.xlu1 %v1773_v49, %s1855_s14 }
 0xd51   :  { %v831_v50 = vpop.permute.xlu0 %830 }
 0xd52   :  { %v833_v51 = vmul.f32 %v1767_v35, %v831_v50 }
 0xd54   :  { %v834_v52 = vpack.c.bf16 %v833_v51, %v833_v51 }
 0xd56   :  { %836 = vrot.lane.b32.xlu0 %v834_v52, %s1856_s15 }
 0xd61   :  { %v806_v53 = vpop.permute.xlu1 %805 }
 0xd62   :  { %v808_v54 = vmul.f32 %v1769_v16, %v806_v53 }
 0xd64   :  { %v882_v55 = vpack.c.bf16 %v808_v54, %v808_v54 }
 0xd66   :  { %884 = vrot.lane.b32.xlu1 %v882_v55, %s1856_s15 }
 0xdc8   :  { %v837_v56 = vpop.permute.xlu0 %836 }
 0xdc9   :  { %1527 = vmatmul.mubr.msk.bf16.vlgmr.msra.gmra.mrb[20].mxu0 %vm245_vm4, %v837_v56 }
 0xdca   :  { %988 = vmatpush1.bf16.msra.mxu0 %v1940_v20  ;;  %1019 = vmatprep.mubr.bf16.mxu0 %v1857_v22 }
 0xdcb   :  { %989 = vmatprep.subr.bf16.mxu0 %v1945_v21 }
 0xdce   :  { %990 = vmatpush1.bf16.msra.mxu0 %v1953_v23 }
 0xdcf   :  { %1133 = vmatprep.subr.bf16.mxu0 %v1935_v19 }
 0xdd8   :  { %v885_v57 = vpop.permute.xlu1 %884 }
 0xdd9   :  { %1636 = vmatmul.mubr.msk.bf16.vlgmr.msra.gmra.mrb[20].mxu1 %vm245_vm4, %v885_v57 }
 0xdda   :  { %1640 = vmatpush3.bf16.msra.mxu1 %v1968_v29  ;;  %1643 = vmatprep.mubr.msk.bf16.mxu1 %vm1859_vm5, %v1858_v25 }
 0xddb   :  { %1641 = vmatprep.subr.bf16.mxu1 %v1858_v25 }
 0xdde   :  { %1642 = vmatpush3.bf16.msra.mxu1 %v1975_v31 }
 0xddf   :  { %1647 = vmatprep.subr.bf16.mxu1 %v1858_v25 }
 0xe9c   :  { %v875_v59 = vpop.f32.mrb[20].mxu0 }
 0xe9d   :  { %v955_v60 = vadd.f32 %v875_v59, %v169_v58  ;;  %v877_v62 = vpop.f32.mrb[21].mxu0 }
 0xe9e   :  { %v879_v63 = vpop.f32.mrb[22].mxu0 }
 0xe9f   :  { %1774 = vtanh.f32 %v955_v60  ;;  %v880_v1 = vpop.f32.mrb[23].mxu0  ;;  %v1530_v18 = vmul.f32 -1.442695, %v955_v60 }
 0xea9   :  { %v1775_v2 = vpop.eup %1774 }
 0xeaa   :  { %965 = vrot.lane.b32.xlu0 %v1775_v2, %s1855_s14 }
 0xeac   :  { %v923_v3 = vpop.f32.mrb[20].mxu1 }
 0xead   :  { %v929_v4 = vadd.f32 %v923_v3, %v877_v62  ;;  %v1637_v6 = vpop.f32.mrb[21].mxu1 }
 0xeae   :  { %v926_v61 = vpop.f32.mrb[22].mxu1 }
 0xeaf   :  { %v930_v7 = vadd.f32 %v1993_v38, %v929_v4  ;;  %v1638_v8 = vpop.f32.mrb[23].mxu1 }
 0xeb1   :  { %1776 = vtanh.f32 %v930_v7  ;;  %v1529_v11 = vmul.f32 -1.442695, %v930_v7 }
 0xeb2   :  { %1778 = vpow2.f32 %v1530_v18 }
 0xebb   :  { %v1777_v9 = vpop.eup %1776 }
 0xebc   :  { %940 = vrot.lane.b32.xlu1 %v1777_v9, %s1855_s14  ;;  %v1779_v10 = vpop.eup %1778 }
 0xebd   :  { %v959_v0 = vadd.f32 1.0, %v1779_v10 }
 0xebf   :  { %1780 = vrcp.f32 %v959_v0 }
 0xec0   :  { %1782 = vpow2.f32 %v1529_v11 }
 0xec9   :  { %v1781_v12 = vpop.eup %1780 }
 0xeca   :  { %v1783_v14 = vpop.eup %1782  ;;  %v963_v32 = vmul.f32 %v1781_v12, %v2130_v44 }
 0xecb   :  { %v934_v17 = vadd.f32 1.0, %v1783_v14 }
 0xecd   :  { %1784 = vrcp.f32 %v934_v17 }
 0xed7   :  { %v1785_v28 = vpop.eup %1784 }
 0xed8   :  { %v938_v36 = vmul.f32 %v1785_v28, %v2135_v48  ;;  %v174_v48 = vadd.f32 %v1924_v5, %v2044_v27 }
 0xf1c   :  { %v966_v13 = vpop.permute.xlu0 %965 }
 0xf1d   :  { %v968_v15 = vmul.f32 %v1781_v12, %v966_v13 }
 0xf1f   :  { %970 = vrot.lane.b32.xlu0 %v968_v15, %s1856_s15 }
 0xf2e   :  { %v941_v24 = vpop.permute.xlu1 %940 }
 0xf2f   :  { %v943_v30 = vmul.f32 %v1785_v28, %v941_v24 }
 0xf31   :  { %945 = vrot.lane.b32.xlu1 %v943_v30, %s1856_s15 }
 0xf91   :  { %v971_v33 = vpop.permute.xlu0 %970 }
 0xf92   :  { %v2162_v34 = vadd.f32 %v971_v33, %v963_v32 }
 0xf94   :  { %1786 = vtanh.f32 %v2162_v34 }
 0xf9e   :  { %v1787_v35 = vpop.eup %1786 }
 0xf9f   :  { %976 = vrot.lane.b32.xlu0 %v1787_v35, %s1855_s14 }
 0xfa3   :  { %v946_v37 = vpop.permute.xlu1 %945 }
 0xfa4   :  { %v2167_v39 = vadd.f32 %v946_v37, %v938_v36 }
 0xfa6   :  { %1788 = vtanh.f32 %v2167_v39 }
 0xfb0   :  { %v1789_v16 = vpop.eup %1788 }
 0xfb1   :  { %951 = vrot.lane.b32.xlu1 %v1789_v16, %s1855_s14 }
0x1011   :  { %v977_v40 = vpop.permute.xlu0 %976 }
0x1012   :  { %v979_v41 = vmul.f32 %v1781_v12, %v977_v40 }
0x1014   :  { %v980_v42 = vpack.c.bf16 %v979_v41, %v979_v41 }
0x1016   :  { %982 = vrot.lane.b32.xlu0 %v980_v42, %s1856_s15 }
0x1023   :  { %v952_v43 = vpop.permute.xlu1 %951 }
0x1024   :  { %v954_v44 = vmul.f32 %v1785_v28, %v952_v43 }
0x1026   :  { %v1028_v45 = vpack.c.bf16 %v954_v44, %v954_v44 }
0x1028   :  { %1030 = vrot.lane.b32.xlu1 %v1028_v45, %s1856_s15 }
0x1088   :  { %v983_v46 = vpop.permute.xlu0 %982 }
0x1089   :  { %1531 = vmatmul.mubr.msk.bf16.vlgmr.msra.gmra.mrb[24].mxu0 %vm245_vm4, %v983_v46 }
0x108a   :  { %1134 = vmatpush1.bf16.msra.mxu0 %v1940_v20  ;;  %1165 = vmatprep.mubr.bf16.mxu0 %v1857_v22 }
0x108b   :  { %1135 = vmatprep.subr.bf16.mxu0 %v1945_v21 }
0x108e   :  { %1136 = vmatpush1.bf16.msra.mxu0 %v1953_v23 }
0x108f   :  { %1279 = vmatprep.subr.bf16.mxu0 %v1935_v19 }
0x109a   :  { %v1031_v47 = vpop.permute.xlu1 %1030 }
0x109b   :  { %1644 = vmatmul.mubr.msk.bf16.vlgmr.msra.gmra.mrb[24].mxu1 %vm245_vm4, %v1031_v47 }
0x109c   :  { %1648 = vmatpush3.bf16.msra.mxu1 %v1968_v29  ;;  %1651 = vmatprep.mubr.msk.bf16.mxu1 %vm1859_vm5, %v1858_v25 }
0x109d   :  { %1649 = vmatprep.subr.bf16.mxu1 %v1858_v25 }
0x10a0   :  { %1650 = vmatpush3.bf16.msra.mxu1 %v1975_v31 }
0x10a1   :  { %1655 = vmatprep.subr.bf16.mxu1 %v1858_v25 }
0x115c   :  { %v1021_v49 = vpop.f32.mrb[24].mxu0 }
0x115d   :  { %v1101_v50 = vadd.f32 %v1021_v49, %v174_v48  ;;  %v1023_v19 = vpop.f32.mrb[25].mxu0 }
0x115e   :  { %v1025_v51 = vpop.f32.mrb[26].mxu0 }
0x115f   :  { %1790 = vtanh.f32 %v1101_v50  ;;  %v1026_v52 = vpop.f32.mrb[27].mxu0  ;;  %v1534_v27 = vmul.f32 -1.442695, %v1101_v50 }
0x1169   :  { %v1791_v53 = vpop.eup %1790 }
0x116a   :  { %1111 = vrot.lane.b32.xlu0 %v1791_v53, %s1855_s14 }
0x116e   :  { %v1069_v54 = vpop.f32.mrb[24].mxu1 }
0x116f   :  { %v1075_v55 = vadd.f32 %v1069_v54, %v1023_v19  ;;  %v1645_v56 = vpop.f32.mrb[25].mxu1 }
0x1170   :  { %v1072_v57 = vpop.f32.mrb[26].mxu1 }
0x1171   :  { %v1076_v58 = vadd.f32 %v1993_v38, %v1075_v55  ;;  %v1646_v59 = vpop.f32.mrb[27].mxu1 }
0x1173   :  { %1792 = vtanh.f32 %v1076_v58  ;;  %v1533_v1 = vmul.f32 -1.442695, %v1076_v58 }
0x1174   :  { %1794 = vpow2.f32 %v1534_v27 }
0x117d   :  { %v1793_v60 = vpop.eup %1792 }
0x117e   :  { %1086 = vrot.lane.b32.xlu1 %v1793_v60, %s1855_s14  ;;  %v1795_v62 = vpop.eup %1794 }
0x117f   :  { %v1105_v63 = vadd.f32 1.0, %v1795_v62 }
0x1181   :  { %1796 = vrcp.f32 %v1105_v63 }
0x1182   :  { %1798 = vpow2.f32 %v1533_v1 }
0x118b   :  { %v1797_v2 = vpop.eup %1796 }
0x118c   :  { %v1799_v6 = vpop.eup %1798  ;;  %v1109_v18 = vmul.f32 %v1797_v2, %v2162_v34 }
0x118d   :  { %v1080_v61 = vadd.f32 1.0, %v1799_v6 }
0x118f   :  { %1800 = vrcp.f32 %v1080_v61 }
0x1199   :  { %v1801_v7 = vpop.eup %1800 }
0x119a   :  { %v1084_v12 = vmul.f32 %v1801_v7, %v2167_v39 }
0x11dc   :  { %v1112_v3 = vpop.permute.xlu0 %1111 }
0x11dd   :  { %v1114_v4 = vmul.f32 %v1797_v2, %v1112_v3 }
0x11df   :  { %1116 = vrot.lane.b32.xlu0 %v1114_v4, %s1856_s15 }
0x11f0   :  { %v1087_v8 = vpop.permute.xlu1 %1086 }
0x11f1   :  { %v1089_v9 = vmul.f32 %v1801_v7, %v1087_v8 }
0x11f3   :  { %1091 = vrot.lane.b32.xlu1 %v1089_v9, %s1856_s15 }
0x1251   :  { %v1117_v10 = vpop.permute.xlu0 %1116 }
0x1252   :  { %v2194_v0 = vadd.f32 %v1117_v10, %v1109_v18 }
0x1254   :  { %1802 = vtanh.f32 %v2194_v0 }
0x125e   :  { %v1803_v11 = vpop.eup %1802 }
0x125f   :  { %1122 = vrot.lane.b32.xlu0 %v1803_v11, %s1855_s14 }
0x1265   :  { %v1092_v13 = vpop.permute.xlu1 %1091 }
0x1266   :  { %v2199_v14 = vadd.f32 %v1092_v13, %v1084_v12 }
0x1268   :  { %1804 = vtanh.f32 %v2199_v14 }
0x1272   :  { %v1805_v15 = vpop.eup %1804 }
0x1273   :  { %1097 = vrot.lane.b32.xlu1 %v1805_v15, %s1855_s14 }
0x12d1   :  { %v1123_v17 = vpop.permute.xlu0 %1122 }
0x12d2   :  { %v1125_v28 = vmul.f32 %v1797_v2, %v1123_v17 }
0x12d4   :  { %v1126_v24 = vpack.c.bf16 %v1125_v28, %v1125_v28 }
0x12d6   :  { %1128 = vrot.lane.b32.xlu0 %v1126_v24, %s1856_s15 }
0x12e5   :  { %v1098_v30 = vpop.permute.xlu1 %1097 }
0x12e6   :  { %v1100_v32 = vmul.f32 %v1801_v7, %v1098_v30 }
0x12e8   :  { %v1174_v33 = vpack.c.bf16 %v1100_v32, %v1100_v32 }
0x12ea   :  { %1176 = vrot.lane.b32.xlu1 %v1174_v33, %s1856_s15 }
0x1348   :  { %v1129_v34 = vpop.permute.xlu0 %1128 }
0x1349   :  { %1535 = vmatmul.mubr.msk.bf16.vlgmr.msra.gmra.mrb[28].mxu0 %vm245_vm4, %v1129_v34 }
0x134a   :  { %1280 = vmatpush1.bf16.msra.mxu0 %v1940_v20  ;;  %1311 = vmatprep.mubr.bf16.mxu0 %v1857_v22  ;;  %v179_v20 = vadd.f32 %v2042_v26, %v1924_v5 }
0x134b   :  { %1281 = vmatprep.subr.bf16.mxu0 %v1945_v21 }
0x134e   :  { %1282 = vmatpush1.bf16.msra.mxu0 %v1953_v23 }
0x135c   :  { %v1177_v35 = vpop.permute.xlu1 %1176 }
0x135d   :  { %1652 = vmatmul.mubr.msk.bf16.vlgmr.msra.gmra.mrb[28].mxu1 %vm245_vm4, %v1177_v35  ;;  %v1393_v35 = vld [vmem:[%s2272_s6 + $0x8] sm:$0xff] }
0x135e   :  { %1656 = vmatpush3.bf16.msra.mxu1 %v1968_v29  ;;  %1659 = vmatprep.mubr.msk.bf16.mxu1 %vm1859_vm5, %v1858_v25 }
0x135f   :  { %1657 = vmatprep.subr.bf16.mxu1 %v1858_v25 }
0x1362   :  { %1658 = vmatpush3.bf16.msra.mxu1 %v1975_v31 }
0x141c   :  { %v1167_v22 = vpop.f32.mrb[28].mxu0 }
0x141d   :  { %v1247_v36 = vadd.f32 %v1167_v22, %v179_v20  ;;  %v1169_v21 = vpop.f32.mrb[29].mxu0  ;;  %v1394_v20 = vld [vmem:[%s2272_s6 + $0x10] sm:$0xff]  ;;  %v1860_v22 = vmov 0.0|0.0  }
0x141e   :  { %v1171_v37 = vpop.f32.mrb[30].mxu0  ;;  %1680 = vmatprep.subr.bf16.mxu0 %v1860_v22 }
0x141f   :  { %1806 = vtanh.f32 %v1247_v36  ;;  %v1172_v23 = vpop.f32.mrb[31].mxu0  ;;  %v1538_v5 = vmul.f32 -1.442695, %v1247_v36 }
0x1429   :  { %v1807_v39 = vpop.eup %1806 }
0x142a   :  { %1257 = vrot.lane.b32.xlu0 %v1807_v39, %s1855_s14 }
0x1430   :  { %v1215_v29 = vpop.f32.mrb[28].mxu1 }
0x1431   :  { %v1221_v16 = vadd.f32 %v1215_v29, %v1169_v21  ;;  %v1653_v40 = vpop.f32.mrb[29].mxu1  ;;  %v1395_v21 = vld [vmem:[%s2272_s6 + $0x18] sm:$0xff] }
0x1432   :  { %v1218_v41 = vpop.f32.mrb[30].mxu1  ;;  %v1684_v37 = vpack.c.bf16 %v1395_v21, %v1394_v20  ;;  %v1542_v40 = vld [vmem:[%s2273_s7] ss:$0 sm:$0xff] }
0x1433   :  { %v1222_v42 = vadd.f32 %v1993_v38, %v1221_v16  ;;  %v1654_v43 = vpop.f32.mrb[31].mxu1 }
0x1435   :  { %1808 = vtanh.f32 %v1222_v42  ;;  %v1537_v45 = vmul.f32 -1.442695, %v1222_v42 }
0x1436   :  { %1810 = vpow2.f32 %v1538_v5 }
0x143f   :  { %v1809_v31 = vpop.eup %1808 }
0x1440   :  { %1232 = vrot.lane.b32.xlu1 %v1809_v31, %s1855_s14  ;;  %v1811_v26 = vpop.eup %1810 }
0x1441   :  { %v1251_v44 = vadd.f32 1.0, %v1811_v26 }
0x1443   :  { %1812 = vrcp.f32 %v1251_v44 }
0x1444   :  { %1814 = vpow2.f32 %v1537_v45 }
0x144d   :  { %v1813_v46 = vpop.eup %1812 }
0x144e   :  { %v1815_v49 = vpop.eup %1814  ;;  %v1255_v53 = vmul.f32 %v1813_v46, %v2194_v0 }
0x144f   :  { %v1226_v50 = vadd.f32 1.0, %v1815_v49 }
0x1451   :  { %1816 = vrcp.f32 %v1226_v50 }
0x145b   :  { %v1817_v19 = vpop.eup %1816 }
0x145c   :  { %v1230_v57 = vmul.f32 %v1817_v19, %v2199_v14 }
0x149c   :  { %v1258_v47 = vpop.permute.xlu0 %1257 }
0x149d   :  { %v1260_v48 = vmul.f32 %v1813_v46, %v1258_v47 }
0x149f   :  { %1262 = vrot.lane.b32.xlu0 %v1260_v48, %s1856_s15 }
0x14b2   :  { %v1233_v51 = vpop.permute.xlu1 %1232 }
0x14b3   :  { %v1235_v52 = vmul.f32 %v1817_v19, %v1233_v51 }
0x14b5   :  { %1237 = vrot.lane.b32.xlu1 %v1235_v52, %s1856_s15 }
0x1511   :  { %v1263_v54 = vpop.permute.xlu0 %1262 }
0x1512   :  { %v1265_v55 = vadd.f32 %v1263_v54, %v1255_v53 }
0x1514   :  { %1818 = vtanh.f32 %v1265_v55 }
0x151e   :  { %v1819_v56 = vpop.eup %1818 }
0x151f   :  { %1268 = vrot.lane.b32.xlu0 %v1819_v56, %s1855_s14 }
0x1527   :  { %v1238_v58 = vpop.permute.xlu1 %1237 }
0x1528   :  { %v1240_v59 = vadd.f32 %v1238_v58, %v1230_v57 }
0x152a   :  { %1820 = vtanh.f32 %v1240_v59 }
0x1534   :  { %v1821_v60 = vpop.eup %1820 }
0x1535   :  { %1243 = vrot.lane.b32.xlu1 %v1821_v60, %s1855_s14 }
0x1591   :  { %v1269_v27 = vpop.permute.xlu0 %1268 }
0x1592   :  { %v1271_v62 = vmul.f32 %v1813_v46, %v1269_v27 }
0x1594   :  { %v1272_v63 = vpack.c.bf16 %v1271_v62, %v1271_v62 }
0x1596   :  { %1274 = vrot.lane.b32.xlu0 %v1272_v63, %s1856_s15 }
0x15a7   :  { %v1244_v1 = vpop.permute.xlu1 %1243 }
0x15a8   :  { %v1246_v2 = vmul.f32 %v1817_v19, %v1244_v1 }
0x15aa   :  { %v1319_v3 = vpack.c.bf16 %v1246_v2, %v1246_v2 }
0x15ac   :  { %1321 = vrot.lane.b32.xlu1 %v1319_v3, %s1856_s15 }
0x1608   :  { %v1275_v4 = vpop.permute.xlu0 %1274 }
0x1609   :  { %1539 = vmatmul.mubr.msk.bf16.vlgmr.msra.gmra.mrb[32].mxu0 %vm245_vm4, %v1275_v4 }
0x160a   :  { %1671 = vmatprep.mubr.msk.f32.mxu0 %vm1859_vm5, %v1858_v25 }
0x161e   :  { %v1322_v6 = vpop.permute.xlu1 %1321 }
0x161f   :  { %1660 = vmatmul.mubr.msk.bf16.vlgmr.msra.gmra.mrb[32].mxu1 %vm245_vm4, %v1322_v6 }
0x16dc   :  { %v1313_v61 = vpop.f32.mrb[32].mxu0 }
0x16dd   :  { %v1314_v7 = vpop.f32.mrb[33].mxu0 }
0x16de   :  { %v1316_v8 = vpop.f32.mrb[34].mxu0 }
0x16df   :  { %v1317_v9 = vpop.f32.mrb[35].mxu0 }
0x16f2   :  { %v1360_v18 = vpop.f32.mrb[32].mxu1 }
0x16f3   :  { %v1366_v10 = vadd.f32 %v1360_v18, %v1314_v7  ;;  %v1661_v0 = vpop.f32.mrb[33].mxu1 }
0x16f4   :  { %v1363_v11 = vpop.f32.mrb[34].mxu1 }
0x16f5   :  { %v1367_v12 = vadd.f32 %v1993_v38, %v1366_v10  ;;  %v1662_v13 = vpop.f32.mrb[35].mxu1  ;;  %v1392_v38 = vld [vmem:[%s2272_s6] sm:$0xff]  ;;  %s1486_s6 = sshll.u32 %s1861_s24, 4  ;;  %s1487_s6 = int_to_ptr.vmem [resolvable:$true] %s1486_s6 }
0x16f6   :  { %v1681_v36 = vpack.c.bf16 %v1393_v35, %v1392_v38  ;;  %p1835_p1 = scmp.lt.s32.totalorder %s1487_s6, %s1487_s6 }
0x16f7   :  { %1822 = vtanh.f32 %v1367_v12  ;;  %v1541_v15 = vmul.f32 -1.442695, %v1367_v12 }
0x16f8   :  { %1682 = vmatpush3.bf16.msra.mxu0 %v1681_v36 }
0x16f9   :  { %1824 = vpow2.f32 %v1541_v15  ;;  %1683 = vmatprep.subr.bf16.mxu0 %v1860_v22 }
0x16fc   :  { %1685 = vmatpush3.bf16.msra.mxu0 %v1684_v37 }
0x1701   :  { %v1823_v14 = vpop.eup %1822 }
0x1702   :  { %1377 = vrot.lane.b32.xlu0 %v1823_v14, %s1855_s14 }
0x1703   :  { %v1825_v25 = vpop.eup %1824 }
0x1704   :  { %v1371_v17 = vadd.f32 1.0, %v1825_v25 }
0x1706   :  { %1826 = vrcp.f32 %v1371_v17 }
0x1710   :  { %v1827_v28 = vpop.eup %1826 }
0x1711   :  { %v1375_v32 = vmul.f32 %v1827_v28, %v1240_v59 }
0x1774   :  { %v1378_v24 = vpop.permute.xlu0 %1377 }
0x1775   :  { %v1380_v30 = vmul.f32 %v1827_v28, %v1378_v24 }
0x1777   :  { %1382 = vrot.lane.b32.xlu1 %v1380_v30, %s1856_s15 }
0x17e9   :  { %v1383_v33 = vpop.permute.xlu1 %1382 }
0x17ea   :  { %v1385_v34 = vadd.f32 %v1383_v33, %v1375_v32 }
0x17ec   :  { %1828 = vtanh.f32 %v1385_v34 }
0x17f6   :  { %v1829_v23 = vpop.eup %1828 }
0x17f7   :  { %1388 = vrot.lane.b32.xlu0 %v1829_v23, %s1855_s14  ;;  %s1830_s14 = scalar_lea.vmem %s1487_s6, 128 }
0x17f8   :  { %p1831_p0 = scmp.ne.s32.totalorder %s1487_s6, %s1830_s14  ;;  %p1836_p2 = scmp.lt.s32.totalorder %s1830_s14, %s1830_s14 }
0x17fa   :  { %p1837_p3 = por %p1836_p2, %p1835_p1 }
0x17fc   :  { %p1838_p4 = pnand %p1837_p3, %p1831_p0 }
0x1869   :  { %v1389_v39 = vpop.permute.xlu0 %1388 }
0x186a   :  { %v1391_v29 = vmul.f32 %v1827_v28, %v1389_v39 }
0x186c   :  { %1404 = vrot.lane.b32.xlu1 %v1391_v29, %s1856_s15 }
0x18de   :  { %v1405_v16 = vpop.permute.xlu1 %1404 }
0x18df   :  { %1672 = vmatmul.mubr.msk.f32.vlgmr.msra.gmra.mrb[36].mxu0 %vm245_vm4, %v1405_v16 }
0x19b2   :  { %v1474_v41 = vpop.f32.mrb[36].mxu0 }
0x19b3   :  { %v1475_v42 = vadd.f32 %v1542_v40, %v1474_v41  ;;  %v1673_v43 = vpop.f32.mrb[37].mxu0 }
0x19b5   :  { %1479 = vst.msk [vmem:[#allocation2] sm:$0xff] %vm1478_vm6, %v1475_v42 }
0x19b6   :  { %1841 = shalt.err (!%p1838_p4)
}
0x19b7   :  { %s1842_s4 = scalar_lea.hbm %s2274_s8, 128 }
0x19b8   :  { %p1843_p5 = scmp.ne.s32.totalorder %s2274_s8, %s1842_s4  ;;  %p1846_p6 = scmp.lt.u32.totalorder %s1842_s4, %s2274_s8 }
0x19ba   :  { %p1848_p7 = pnand %p1846_p6, %p1843_p5 }
0x19bc   :  { %1851 = shalt.err (!%p1848_p7)
}
0x19bd   :  { %1489 = dma.vmem_to_hbm [thread:$0]  %s1487_s6, 128, %s2274_s8, [#allocation3]  }
0x19be   :  { %1852 = dma.done.wait [#allocation3], 128  }
0x19bf   :  { %1853 = vsyncadd [#allocation3], 4294967168 }
0x19c0   :  { %1493 = vsyncpa [#allocation3], 1 }

</bundles_post_ra>
